<compile_context>
chip_gen: v7x
topology: tpu7x:2x2x1
jax: 0.10.0
libtpu: 0.0.40
codegen_flags: <defaults>
</compile_context>

<pallas_src>
import functools

import jax
import jax.numpy as jnp
import numpy as np
from jax import lax
from jax.experimental import pallas as pl
from jax.experimental.pallas import tpu as pltpu


# ---------------------------------------------------------------------------
# Pallas kernel: fused  conv3x3 -> (+shift) -> (+residual) -> LeakyReLU
#                       -> [avgpool(k)] -> [mu/var head]
# ---------------------------------------------------------------------------
def _conv_block_kernel(x_ref, w_ref, shift_ref, *rest, pool, has_res, has_head):
    i = 0
    ph_ref = pw_ref = res_ref = wh_ref = bh_ref = None
    if pool > 1:
        ph_ref, pw_ref = rest[i], rest[i + 1]
        i += 2
    if has_res:
        res_ref = rest[i]
        i += 1
    if has_head:
        wh_ref, bh_ref = rest[i], rest[i + 1]
        i += 2
    out_ref = rest[i]

    h_rows = x_ref.shape[0] - 2  # output rows H (pre-pool); input has 1-row halo

    # 3x3 conv as 3 lane-dense matmuls (one per kernel row dy); the dx taps are
    # encoded in the banded weight slabs.  bf16 inputs, f32 MXU accumulation.
    acc = jnp.dot(x_ref[0:h_rows, :], w_ref[0], preferred_element_type=jnp.float32)
    acc = acc + jnp.dot(x_ref[1:1 + h_rows, :], w_ref[1],
                        preferred_element_type=jnp.float32)
    acc = acc + jnp.dot(x_ref[2:2 + h_rows, :], w_ref[2],
                        preferred_element_type=jnp.float32)

    y = acc + shift_ref[...]          # folded conv-bias + BatchNorm (scale is in w)
    if has_res:
        y = y + res_ref[...]          # residual add before the final LeakyReLU
    y = jnp.where(y > 0, y, 0.2 * y)  # LeakyReLU(0.2), f32 on the VPU

    if pool > 1:                      # AvgPool2d(k) fused as two small f32 matmuls
        y = jnp.dot(ph_ref[...], y, preferred_element_type=jnp.float32)
        y = jnp.dot(y, pw_ref[...], preferred_element_type=jnp.float32)

    if has_head:                      # fused mu/var 1x1-conv head (f32)
        y = jnp.dot(y, wh_ref[...], preferred_element_type=jnp.float32) + bh_ref[...]

    out_ref[...] = y


# ---------------------------------------------------------------------------
# Wrapper-side packing helpers (run once per layer inside jit; tiny XLA work)
# ---------------------------------------------------------------------------
def _pack_conv_weights(w_hwio, scale, W):
    """(3,3,Cin,Cout) -> banded bf16 slabs (3, (W+2)*Cin, W*Cout), BN scale folded."""
    Cin, Cout = w_hwio.shape[2], w_hwio.shape[3]
    w = (w_hwio.astype(jnp.float32) * scale[None, None, None, :].astype(jnp.float32))
    eye_w = jnp.eye(W, dtype=jnp.float32)
    slabs = []
    for dy in range(3):
        acc = jnp.zeros(((W + 2) * Cin, W * Cout), jnp.float32)
        for dx in range(3):
            blk = jnp.kron(eye_w, w[dy, dx])                       # (W*Cin, W*Cout)
            acc = acc + jnp.pad(blk, ((dx * Cin, (2 - dx) * Cin), (0, 0)))
        slabs.append(acc)
    return jnp.stack(slabs).astype(jnp.bfloat16)


def _pool_mats(H, W, C, k):
    """Row/col pooling matrices so avgpool(k) = Ph @ y @ Pw in the packed layout."""
    Ho, Wo = H // k, W // k
    ph = jnp.kron(jnp.eye(Ho, dtype=jnp.float32),
                  jnp.ones((1, k), jnp.float32)) / k               # (Ho, H)
    pw = jnp.kron(jnp.kron(jnp.eye(Wo, dtype=jnp.float32),
                           jnp.ones((k, 1), jnp.float32)),
                  jnp.eye(C, dtype=jnp.float32)) / k               # (W*C, Wo*C)
    return ph, pw


def fold_bn(bn, conv_bias=None, eps=1e-5):
    """Fold (optional conv bias) + inference BatchNorm into per-channel scale/shift."""
    gamma, beta, mean, var = bn
    scale = gamma / jnp.sqrt(var + eps)
    shift = beta - mean * scale
    if conv_bias is not None:
        shift = shift + conv_bias * scale
    return scale, shift


# ---------------------------------------------------------------------------
# pallas_call wrapper for one fused conv block
# ---------------------------------------------------------------------------
def conv3x3_fused(x_nhwc, w_hwio, scale, shift, *, pool=1, residual=None, head=None):
    """x_nhwc: (N,H,W,Cin) f32.  Returns the packed f32 activation (N, Ho, Wo*Cout),
    or the fused head output (N, H, W*2) when head=(w_head, b_head) is given."""
    N, H, W, Cin = x_nhwc.shape
    Cout = w_hwio.shape[-1]
    Ho, Wo = H // pool, W // pool
    if head is not None:
        assert pool == 1, "head fusion assumes no pooling in the same kernel"

    # Pad spatially in the wrapper; pack (H+2, W+2, Cin) -> (H+2, (W+2)*Cin) bf16.
    xp = jnp.pad(x_nhwc, ((0, 0), (1, 1), (1, 1), (0, 0)))
    xp = xp.reshape(N, H + 2, (W + 2) * Cin).astype(jnp.bfloat16)
    wb = _pack_conv_weights(w_hwio, scale, W)                      # bf16
    shift_p = jnp.tile(shift.astype(jnp.float32), W).reshape(1, W * Cout)

    args = [xp, wb, shift_p]
    in_specs = [
        pl.BlockSpec((None, H + 2, (W + 2) * Cin), lambda n: (n, 0, 0)),
        pl.BlockSpec((3, (W + 2) * Cin, W * Cout), lambda n: (0, 0, 0)),
        pl.BlockSpec((1, W * Cout), lambda n: (0, 0)),
    ]

    if pool > 1:
        ph, pw = _pool_mats(H, W, Cout, pool)
        args += [ph, pw]
        in_specs += [pl.BlockSpec((Ho, H), lambda n: (0, 0)),
                     pl.BlockSpec((W * Cout, Wo * Cout), lambda n: (0, 0))]

    has_res = residual is not None
    if has_res:
        args.append(residual)                                      # (N, H, W*Cout) f32
        in_specs.append(pl.BlockSpec((None, H, W * Cout), lambda n: (n, 0, 0)))

    has_head = head is not None
    if has_head:
        w_head, b_head = head                                      # (Cout, 2), (2,)
        wh = jnp.kron(jnp.eye(W, dtype=jnp.float32),
                      w_head.astype(jnp.float32))                  # (W*Cout, W*2)
        bh = jnp.tile(b_head.astype(jnp.float32), W).reshape(1, W * 2)
        args += [wh, bh]
        in_specs += [pl.BlockSpec((W * Cout, W * 2), lambda n: (0, 0)),
                     pl.BlockSpec((1, W * 2), lambda n: (0, 0))]
        out_shape = jax.ShapeDtypeStruct((N, H, W * 2), jnp.float32)
        out_spec = pl.BlockSpec((None, H, W * 2), lambda n: (n, 0, 0))
    else:
        out_shape = jax.ShapeDtypeStruct((N, Ho, Wo * Cout), jnp.float32)
        out_spec = pl.BlockSpec((None, Ho, Wo * Cout), lambda n: (n, 0, 0))

    kernel = functools.partial(_conv_block_kernel, pool=pool,
                               has_res=has_res, has_head=has_head)
    return pl.pallas_call(
        kernel,
        out_shape=out_shape,
        grid=(N,),
        in_specs=in_specs,
        out_specs=out_spec,
        compiler_params=pltpu.CompilerParams(
            dimension_semantics=("parallel",),
            vmem_limit_bytes=32 * 1024 * 1024),
    )(*args)


# ---------------------------------------------------------------------------
# VAEResNetEncoder forward
# ---------------------------------------------------------------------------
def vae_resnet_encoder(x_nchw, params):
    x = jnp.transpose(x_nchw, (0, 2, 3, 1)).astype(jnp.float32)    # NCHW -> NHWC
    N, H, W = x.shape[0], x.shape[1], x.shape[2]

    head_w = jnp.concatenate([params["mu_w"], params["var_w"]], axis=1)  # (C, 2)
    head_b = jnp.concatenate([params["mu_b"], params["var_b"]])          # (2,)
    blocks = params["blocks"]

    stem = params["stem"]
    s, sh = fold_bn(stem["bn"], conv_bias=stem["b"])
    stem_head = (head_w, head_b) if len(blocks) == 0 else None
    h = conv3x3_fused(x, stem["w"], s, sh, pool=1, head=stem_head)
    C = stem["w"].shape[-1]

    if len(blocks) == 0:
        head_out = h
    else:
        for bi, blk in enumerate(blocks):
            k = blk["stride"]
            Cout = blk["w1"].shape[-1]
            shortcut = h                                           # packed (N,H,W*C)

            s1, sh1 = fold_bn(blk["bn1"])
            h1 = conv3x3_fused(h.reshape(N, H, W, C), blk["w1"], s1, sh1, pool=k)
            Ho, Wo = H // k, W // k

            s2, sh2 = fold_bn(blk["bn2"])
            is_last = bi == len(blocks) - 1
            res = shortcut if k == 1 else None
            head = (head_w, head_b) if is_last else None
            h = conv3x3_fused(h1.reshape(N, Ho, Wo, Cout), blk["w2"], s2, sh2,
                              pool=1, residual=res, head=head)
            H, W, C = Ho, Wo, Cout
        head_out = h                                               # (N, H, W*2)

    out = head_out.reshape(N, H, W, 2)                             # free reshape
    mu = jnp.transpose(out[..., 0:1], (0, 3, 1, 2))                # back to NCHW
    var = jnp.transpose(out[..., 1:2], (0, 3, 1, 2))
    return mu, var


# ---------------------------------------------------------------------------
# Deterministic parameter init (shapes as in the PyTorch module __init__)
# ---------------------------------------------------------------------------
def init_params(key, in_ch, block_setting):
    def normal(k, shape, s=0.1):
        return s * jax.random.normal(k, shape, jnp.float32)

    def bn_params(k, c):
        k1, k2, k3, k4 = jax.random.split(k, 4)
        gamma = 1.0 + normal(k1, (c,))
        beta = normal(k2, (c,))
        mean = normal(k3, (c,))
        var = 0.5 + jnp.abs(jax.random.normal(k4, (c,), jnp.float32))
        return (gamma, beta, mean, var)

    keys = iter(jax.random.split(key, 128))
    params = {
        "stem": {
            "w": normal(next(keys), (3, 3, 1, in_ch)),   # Conv2d(1, in_ch, 3, bias=True)
            "b": normal(next(keys), (in_ch,)),
            "bn": bn_params(next(keys), in_ch),
        },
        "blocks": [],
    }
    cur = in_ch
    for (c, n, s) in block_setting:
        for i in range(n):
            stride = s if i == 0 else 1
            params["blocks"].append({
                "stride": stride,
                "w1": normal(next(keys), (3, 3, cur, c)),  # Conv2d(in_ch, c, 3, bias=False)
                "bn1": bn_params(next(keys), c),
                "w2": normal(next(keys), (3, 3, c, c)),    # Conv2d(c, c, 3, bias=False)
                "bn2": bn_params(next(keys), c),
            })
            cur = c
    params["mu_w"] = normal(next(keys), (cur, 1))          # Conv2d(inner_ch, 1, 1, bias=True)
    params["mu_b"] = normal(next(keys), (1,))
    params["var_w"] = normal(next(keys), (cur, 1))
    params["var_b"] = normal(next(keys), (1,))
    return params


# ---------------------------------------------------------------------------
# Pure-JAX reference (f32) for correctness check
# ---------------------------------------------------------------------------
def reference_forward(x_nchw, params):
    x = jnp.transpose(x_nchw, (0, 2, 3, 1)).astype(jnp.float32)

    def conv3x3(x, w):
        return lax.conv_general_dilated(
            x, w, window_strides=(1, 1), padding="SAME",
            dimension_numbers=("NHWC", "HWIO", "NHWC"))

    def lrelu(v):
        return jnp.where(v > 0, v, 0.2 * v)

    def bn(v, p, eps=1e-5):
        gamma, beta, mean, var = p
        return gamma * (v - mean) / jnp.sqrt(var + eps) + beta

    stem = params["stem"]
    h = lrelu(bn(conv3x3(x, stem["w"]) + stem["b"], stem["bn"]))
    for blk in params["blocks"]:
        k = blk["stride"]
        shortcut = h
        h2 = lrelu(bn(conv3x3(h, blk["w1"]), blk["bn1"]))
        if k > 1:
            n, hh, ww, c = h2.shape
            h2 = h2.reshape(n, hh // k, k, ww // k, k, c).mean(axis=(2, 4))
        h2 = bn(conv3x3(h2, blk["w2"]), blk["bn2"])
        if k == 1:
            h2 = h2 + shortcut
        h = lrelu(h2)
    mu = jnp.einsum("nhwc,co->nhwo", h, params["mu_w"]) + params["mu_b"]
    var = jnp.einsum("nhwc,co->nhwo", h, params["var_w"]) + params["var_b"]
    return jnp.transpose(mu, (0, 3, 1, 2)), jnp.transpose(var, (0, 3, 1, 2))


if __name__ == "__main__":
    key = jax.random.PRNGKey(0)
    kp, kx = jax.random.split(key)

    in_ch = 4
    block_setting = [[8, 2, 2]]   # (channels, num_blocks, stride): 1 strided + 1 residual block
    params = init_params(kp, in_ch, block_setting)

    # PyTorch module takes NCHW input with a single input channel (stem is Conv2d(1, in_ch, ...))
    x = jax.random.normal(kx, (2, 1, 16, 16), jnp.float32)

    fwd = jax.jit(lambda inp: vae_resnet_encoder(inp, params))
    mu, var = jax.block_until_ready(fwd(x))

    assert mu.shape == (2, 1, 8, 8) and var.shape == (2, 1, 8, 8)

    # bf16 MXU inputs (f32 accumulation) -> allow ~1-2% deviation vs the f32 reference.
    mu_ref, var_ref = reference_forward(x, params)
    np.testing.assert_allclose(np.asarray(mu), np.asarray(mu_ref), rtol=2e-2, atol=2e-2)
    np.testing.assert_allclose(np.asarray(var), np.asarray(var_ref), rtol=2e-2, atol=2e-2)

    print("KERNEL_OK")
</pallas_src>

<mosaic_0001>
module attributes {stable_mosaic.version = 11 : i64} {
  func.func @_conv_block_kernel(%arg0: i32, %arg1: memref<1x18x18xbf16, #tpu.memory_space<vmem>>, %arg2: memref<3x18x64xbf16, #tpu.memory_space<vmem>>, %arg3: memref<1x64xf32, #tpu.memory_space<vmem>>, %arg4: memref<1x16x64xf32, #tpu.memory_space<vmem>>) attributes {dimension_semantics = [#tpu.dimension_semantics<parallel>], iteration_bounds = array<i64: 2>, scalar_prefetch = 0 : i64, scratch_operands = 0 : i64, tpu.core_type = #tpu.core_type<tc>, window_params = [{transform_indices = @transform_0, window_bounds = array<i64: 1, 18, 18>}, {pipeline_mode = #tpu.pipeline_mode<synchronous>, transform_indices = @transform_1, window_bounds = array<i64: 3, 18, 64>}, {pipeline_mode = #tpu.pipeline_mode<synchronous>, transform_indices = @transform_2, window_bounds = array<i64: 1, 64>}, {transform_indices = @transform_3, window_bounds = array<i64: 1, 16, 64>}]} {
    %c0 = arith.constant 0 : index
    %c0_0 = arith.constant 0 : index
    %c0_1 = arith.constant 0 : index
    %0 = vector.load %arg1[%c0, %c0_0, %c0_1] : memref<1x18x18xbf16, #tpu.memory_space<vmem>>, vector<1x16x18xbf16>
    %1 = vector.shape_cast %0 : vector<1x16x18xbf16> to vector<16x18xbf16>
    %c0_2 = arith.constant 0 : index
    %c0_3 = arith.constant 0 : index
    %c0_4 = arith.constant 0 : index
    %2 = vector.load %arg2[%c0_2, %c0_3, %c0_4] : memref<3x18x64xbf16, #tpu.memory_space<vmem>>, vector<1x18x64xbf16>
    %3 = vector.shape_cast %2 : vector<1x18x64xbf16> to vector<18x64xbf16>
    %cst = arith.constant dense<0.000000e+00> : vector<16x64xf32>
    %4 = tpu.matmul %1, %3, %cst {dimension_numbers = #tpu.dot_dimension_numbers<[1], [0], [0], [1], [0, 0, 1, 1], [], []>} : vector<16x18xbf16>, vector<18x64xbf16>, vector<16x64xf32> -> vector<16x64xf32>
    %c0_5 = arith.constant 0 : index
    %c1 = arith.constant 1 : index
    %c0_6 = arith.constant 0 : index
    %5 = vector.load %arg1[%c0_5, %c1, %c0_6] : memref<1x18x18xbf16, #tpu.memory_space<vmem>>, vector<1x16x18xbf16>
    %6 = vector.shape_cast %5 : vector<1x16x18xbf16> to vector<16x18xbf16>
    %c1_7 = arith.constant 1 : index
    %c0_8 = arith.constant 0 : index
    %c0_9 = arith.constant 0 : index
    %7 = vector.load %arg2[%c1_7, %c0_8, %c0_9] : memref<3x18x64xbf16, #tpu.memory_space<vmem>>, vector<1x18x64xbf16>
    %8 = vector.shape_cast %7 : vector<1x18x64xbf16> to vector<18x64xbf16>
    %cst_10 = arith.constant dense<0.000000e+00> : vector<16x64xf32>
    %9 = tpu.matmul %6, %8, %cst_10 {dimension_numbers = #tpu.dot_dimension_numbers<[1], [0], [0], [1], [0, 0, 1, 1], [], []>} : vector<16x18xbf16>, vector<18x64xbf16>, vector<16x64xf32> -> vector<16x64xf32>
    %10 = arith.addf %4, %9 : vector<16x64xf32>
    %c0_11 = arith.constant 0 : index
    %c2 = arith.constant 2 : index
    %c0_12 = arith.constant 0 : index
    %11 = vector.load %arg1[%c0_11, %c2, %c0_12] : memref<1x18x18xbf16, #tpu.memory_space<vmem>>, vector<1x16x18xbf16>
    %12 = vector.shape_cast %11 : vector<1x16x18xbf16> to vector<16x18xbf16>
    %c2_13 = arith.constant 2 : index
    %c0_14 = arith.constant 0 : index
    %c0_15 = arith.constant 0 : index
    %13 = vector.load %arg2[%c2_13, %c0_14, %c0_15] : memref<3x18x64xbf16, #tpu.memory_space<vmem>>, vector<1x18x64xbf16>
    %14 = vector.shape_cast %13 : vector<1x18x64xbf16> to vector<18x64xbf16>
    %cst_16 = arith.constant dense<0.000000e+00> : vector<16x64xf32>
    %15 = tpu.matmul %12, %14, %cst_16 {dimension_numbers = #tpu.dot_dimension_numbers<[1], [0], [0], [1], [0, 0, 1, 1], [], []>} : vector<16x18xbf16>, vector<18x64xbf16>, vector<16x64xf32> -> vector<16x64xf32>
    %16 = arith.addf %10, %15 : vector<16x64xf32>
    %c0_17 = arith.constant 0 : index
    %c0_18 = arith.constant 0 : index
    %17 = vector.load %arg3[%c0_17, %c0_18] : memref<1x64xf32, #tpu.memory_space<vmem>>, vector<1x64xf32>
    %18 = vector.broadcast %17 : vector<1x64xf32> to vector<16x64xf32>
    %19 = arith.addf %16, %18 : vector<16x64xf32>
    %cst_19 = arith.constant 0.000000e+00 : f32
    %20 = vector.broadcast %cst_19 : f32 to vector<16x64xf32>
    %21 = arith.cmpf ogt, %19, %20 : vector<16x64xf32>
    %cst_20 = arith.constant 2.000000e-01 : f32
    %22 = vector.broadcast %cst_20 : f32 to vector<16x64xf32>
    %23 = arith.mulf %22, %19 : vector<16x64xf32>
    %24 = arith.select %21, %19, %23 : vector<16x64xi1>, vector<16x64xf32>
    %c0_21 = arith.constant 0 : index
    %c0_22 = arith.constant 0 : index
    %c0_23 = arith.constant 0 : index
    %25 = vector.load %arg4[%c0_21, %c0_22, %c0_23] : memref<1x16x64xf32, #tpu.memory_space<vmem>>, vector<1x16x64xf32>
    %26 = vector.shape_cast %25 : vector<1x16x64xf32> to vector<16x64xf32>
    %27 = vector.shape_cast %24 : vector<16x64xf32> to vector<1x16x64xf32>
    tpu.vector_store %arg4[%c0_21, %c0_22, %c0_23], %27 {strides = array<i32>} : memref<1x16x64xf32, #tpu.memory_space<vmem>>, vector<1x16x64xf32>,
    return
  }
  func.func @transform_0(%arg0: i32) -> (i32, i32, i32) {
    %c0_i32 = arith.constant 0 : i32
    %c0_i32_0 = arith.constant 0 : i32
    %c0_i32_1 = arith.constant 0 : i32
    return %arg0, %c0_i32, %c0_i32_0 : i32, i32, i32
  }
  func.func @transform_1(%arg0: i32) -> (i32, i32, i32) {
    %c0_i32 = arith.constant 0 : i32
    %c0_i32_0 = arith.constant 0 : i32
    %c0_i32_1 = arith.constant 0 : i32
    %c0_i32_2 = arith.constant 0 : i32
    return %c0_i32, %c0_i32_0, %c0_i32_1 : i32, i32, i32
  }
  func.func @transform_2(%arg0: i32) -> (i32, i32) {
    %c0_i32 = arith.constant 0 : i32
    %c0_i32_0 = arith.constant 0 : i32
    %c0_i32_1 = arith.constant 0 : i32
    return %c0_i32, %c0_i32_0 : i32, i32
  }
  func.func @transform_3(%arg0: i32) -> (i32, i32, i32) {
    %c0_i32 = arith.constant 0 : i32
    %c0_i32_0 = arith.constant 0 : i32
    %c0_i32_1 = arith.constant 0 : i32
    return %arg0, %c0_i32, %c0_i32_0 : i32, i32, i32
  }
}

module attributes {stable_mosaic.version = 11 : i64} {
  func.func @_conv_block_kernel(%arg0: i32, %arg1: memref<1x18x72xbf16, #tpu.memory_space<vmem>>, %arg2: memref<3x72x128xbf16, #tpu.memory_space<vmem>>, %arg3: memref<1x128xf32, #tpu.memory_space<vmem>>, %arg4: memref<8x16xf32, #tpu.memory_space<vmem>>, %arg5: memref<128x64xf32, #tpu.memory_space<vmem>>, %arg6: memref<1x8x64xf32, #tpu.memory_space<vmem>>) attributes {dimension_semantics = [#tpu.dimension_semantics<parallel>], iteration_bounds = array<i64: 2>, scalar_prefetch = 0 : i64, scratch_operands = 0 : i64, tpu.core_type = #tpu.core_type<tc>, window_params = [{transform_indices = @transform_0, window_bounds = array<i64: 1, 18, 72>}, {pipeline_mode = #tpu.pipeline_mode<synchronous>, transform_indices = @transform_1, window_bounds = array<i64: 3, 72, 128>}, {pipeline_mode = #tpu.pipeline_mode<synchronous>, transform_indices = @transform_2, window_bounds = array<i64: 1, 128>}, {pipeline_mode = #tpu.pipeline_mode<synchronous>, transform_indices = @transform_3, window_bounds = array<i64: 8, 16>}, {pipeline_mode = #tpu.pipeline_mode<synchronous>, transform_indices = @transform_4, window_bounds = array<i64: 128, 64>}, {transform_indices = @transform_5, window_bounds = array<i64: 1, 8, 64>}]} {
    %c0 = arith.constant 0 : index
    %c0_0 = arith.constant 0 : index
    %c0_1 = arith.constant 0 : index
    %0 = vector.load %arg1[%c0, %c0_0, %c0_1] : memref<1x18x72xbf16, #tpu.memory_space<vmem>>, vector<1x16x72xbf16>
    %1 = vector.shape_cast %0 : vector<1x16x72xbf16> to vector<16x72xbf16>
    %c0_2 = arith.constant 0 : index
    %c0_3 = arith.constant 0 : index
    %c0_4 = arith.constant 0 : index
    %2 = vector.load %arg2[%c0_2, %c0_3, %c0_4] : memref<3x72x128xbf16, #tpu.memory_space<vmem>>, vector<1x72x128xbf16>
    %3 = vector.shape_cast %2 : vector<1x72x128xbf16> to vector<72x128xbf16>
    %cst = arith.constant dense<0.000000e+00> : vector<16x128xf32>
    %4 = tpu.matmul %1, %3, %cst {dimension_numbers = #tpu.dot_dimension_numbers<[1], [0], [0], [1], [0, 0, 1, 1], [], []>} : vector<16x72xbf16>, vector<72x128xbf16>, vector<16x128xf32> -> vector<16x128xf32>
    %c0_5 = arith.constant 0 : index
    %c1 = arith.constant 1 : index
    %c0_6 = arith.constant 0 : index
    %5 = vector.load %arg1[%c0_5, %c1, %c0_6] : memref<1x18x72xbf16, #tpu.memory_space<vmem>>, vector<1x16x72xbf16>
    %6 = vector.shape_cast %5 : vector<1x16x72xbf16> to vector<16x72xbf16>
    %c1_7 = arith.constant 1 : index
    %c0_8 = arith.constant 0 : index
    %c0_9 = arith.constant 0 : index
    %7 = vector.load %arg2[%c1_7, %c0_8, %c0_9] : memref<3x72x128xbf16, #tpu.memory_space<vmem>>, vector<1x72x128xbf16>
    %8 = vector.shape_cast %7 : vector<1x72x128xbf16> to vector<72x128xbf16>
    %cst_10 = arith.constant dense<0.000000e+00> : vector<16x128xf32>
    %9 = tpu.matmul %6, %8, %cst_10 {dimension_numbers = #tpu.dot_dimension_numbers<[1], [0], [0], [1], [0, 0, 1, 1], [], []>} : vector<16x72xbf16>, vector<72x128xbf16>, vector<16x128xf32> -> vector<16x128xf32>
    %10 = arith.addf %4, %9 : vector<16x128xf32>
    %c0_11 = arith.constant 0 : index
    %c2 = arith.constant 2 : index
    %c0_12 = arith.constant 0 : index
    %11 = vector.load %arg1[%c0_11, %c2, %c0_12] : memref<1x18x72xbf16, #tpu.memory_space<vmem>>, vector<1x16x72xbf16>
    %12 = vector.shape_cast %11 : vector<1x16x72xbf16> to vector<16x72xbf16>
    %c2_13 = arith.constant 2 : index
    %c0_14 = arith.constant 0 : index
    %c0_15 = arith.constant 0 : index
    %13 = vector.load %arg2[%c2_13, %c0_14, %c0_15] : memref<3x72x128xbf16, #tpu.memory_space<vmem>>, vector<1x72x128xbf16>
    %14 = vector.shape_cast %13 : vector<1x72x128xbf16> to vector<72x128xbf16>
    %cst_16 = arith.constant dense<0.000000e+00> : vector<16x128xf32>
    %15 = tpu.matmul %12, %14, %cst_16 {dimension_numbers = #tpu.dot_dimension_numbers<[1], [0], [0], [1], [0, 0, 1, 1], [], []>} : vector<16x72xbf16>, vector<72x128xbf16>, vector<16x128xf32> -> vector<16x128xf32>
    %16 = arith.addf %10, %15 : vector<16x128xf32>
    %c0_17 = arith.constant 0 : index
    %c0_18 = arith.constant 0 : index
    %17 = vector.load %arg3[%c0_17, %c0_18] : memref<1x128xf32, #tpu.memory_space<vmem>>, vector<1x128xf32>
    %18 = vector.broadcast %17 : vector<1x128xf32> to vector<16x128xf32>
    %19 = arith.addf %16, %18 : vector<16x128xf32>
    %cst_19 = arith.constant 0.000000e+00 : f32
    %20 = vector.broadcast %cst_19 : f32 to vector<16x128xf32>
    %21 = arith.cmpf ogt, %19, %20 : vector<16x128xf32>
    %cst_20 = arith.constant 2.000000e-01 : f32
    %22 = vector.broadcast %cst_20 : f32 to vector<16x128xf32>
    %23 = arith.mulf %22, %19 : vector<16x128xf32>
    %24 = arith.select %21, %19, %23 : vector<16x128xi1>, vector<16x128xf32>
    %c0_21 = arith.constant 0 : index
    %c0_22 = arith.constant 0 : index
    %25 = vector.load %arg4[%c0_21, %c0_22] : memref<8x16xf32, #tpu.memory_space<vmem>>, vector<8x16xf32>
    %cst_23 = arith.constant dense<0.000000e+00> : vector<8x128xf32>
    %26 = tpu.matmul %25, %24, %cst_23 {dimension_numbers = #tpu.dot_dimension_numbers<[1], [0], [0], [1], [0, 0, 1, 1], [], []>} : vector<8x16xf32>, vector<16x128xf32>, vector<8x128xf32> -> vector<8x128xf32>
    %c0_24 = arith.constant 0 : index
    %c0_25 = arith.constant 0 : index
    %27 = vector.load %arg5[%c0_24, %c0_25] : memref<128x64xf32, #tpu.memory_space<vmem>>, vector<128x64xf32>
    %cst_26 = arith.constant dense<0.000000e+00> : vector<8x64xf32>
    %28 = tpu.matmul %26, %27, %cst_26 {dimension_numbers = #tpu.dot_dimension_numbers<[1], [0], [0], [1], [0, 0, 1, 1], [], []>} : vector<8x128xf32>, vector<128x64xf32>, vector<8x64xf32> -> vector<8x64xf32>
    %c0_27 = arith.constant 0 : index
    %c0_28 = arith.constant 0 : index
    %c0_29 = arith.constant 0 : index
    %29 = vector.load %arg6[%c0_27, %c0_28, %c0_29] : memref<1x8x64xf32, #tpu.memory_space<vmem>>, vector<1x8x64xf32>
    %30 = vector.shape_cast %29 : vector<1x8x64xf32> to vector<8x64xf32>
    %31 = vector.shape_cast %28 : vector<8x64xf32> to vector<1x8x64xf32>
    tpu.vector_store %arg6[%c0_27, %c0_28, %c0_29], %31 {strides = array<i32>} : memref<1x8x64xf32, #tpu.memory_space<vmem>>, vector<1x8x64xf32>,
    return
  }
  func.func @transform_0(%arg0: i32) -> (i32, i32, i32) {
    %c0_i32 = arith.constant 0 : i32
    %c0_i32_0 = arith.constant 0 : i32
    %c0_i32_1 = arith.constant 0 : i32
    return %arg0, %c0_i32, %c0_i32_0 : i32, i32, i32
  }
  func.func @transform_1(%arg0: i32) -> (i32, i32, i32) {
    %c0_i32 = arith.constant 0 : i32
    %c0_i32_0 = arith.constant 0 : i32
    %c0_i32_1 = arith.constant 0 : i32
    %c0_i32_2 = arith.constant 0 : i32
    return %c0_i32, %c0_i32_0, %c0_i32_1 : i32, i32, i32
  }
  func.func @transform_2(%arg0: i32) -> (i32, i32) {
    %c0_i32 = arith.constant 0 : i32
    %c0_i32_0 = arith.constant 0 : i32
    %c0_i32_1 = arith.constant 0 : i32
    return %c0_i32, %c0_i32_0 : i32, i32
  }
  func.func @transform_3(%arg0: i32) -> (i32, i32) {
    %c0_i32 = arith.constant 0 : i32
    %c0_i32_0 = arith.constant 0 : i32
    %c0_i32_1 = arith.constant 0 : i32
    return %c0_i32, %c0_i32_0 : i32, i32
  }
  func.func @transform_4(%arg0: i32) -> (i32, i32) {
    %c0_i32 = arith.constant 0 : i32
    %c0_i32_0 = arith.constant 0 : i32
    %c0_i32_1 = arith.constant 0 : i32
    return %c0_i32, %c0_i32_0 : i32, i32
  }
  func.func @transform_5(%arg0: i32) -> (i32, i32, i32) {
    %c0_i32 = arith.constant 0 : i32
    %c0_i32_0 = arith.constant 0 : i32
    %c0_i32_1 = arith.constant 0 : i32
    return %arg0, %c0_i32, %c0_i32_0 : i32, i32, i32
  }
}

module attributes {stable_mosaic.version = 11 : i64} {
  func.func @_conv_block_kernel(%arg0: i32, %arg1: memref<1x10x80xbf16, #tpu.memory_space<vmem>>, %arg2: memref<3x80x64xbf16, #tpu.memory_space<vmem>>, %arg3: memref<1x64xf32, #tpu.memory_space<vmem>>, %arg4: memref<1x8x64xf32, #tpu.memory_space<vmem>>) attributes {dimension_semantics = [#tpu.dimension_semantics<parallel>], iteration_bounds = array<i64: 2>, scalar_prefetch = 0 : i64, scratch_operands = 0 : i64, tpu.core_type = #tpu.core_type<tc>, window_params = [{transform_indices = @transform_0, window_bounds = array<i64: 1, 10, 80>}, {pipeline_mode = #tpu.pipeline_mode<synchronous>, transform_indices = @transform_1, window_bounds = array<i64: 3, 80, 64>}, {pipeline_mode = #tpu.pipeline_mode<synchronous>, transform_indices = @transform_2, window_bounds = array<i64: 1, 64>}, {transform_indices = @transform_3, window_bounds = array<i64: 1, 8, 64>}]} {
    %c0 = arith.constant 0 : index
    %c0_0 = arith.constant 0 : index
    %c0_1 = arith.constant 0 : index
    %0 = vector.load %arg1[%c0, %c0_0, %c0_1] : memref<1x10x80xbf16, #tpu.memory_space<vmem>>, vector<1x8x80xbf16>
    %1 = vector.shape_cast %0 : vector<1x8x80xbf16> to vector<8x80xbf16>
    %c0_2 = arith.constant 0 : index
    %c0_3 = arith.constant 0 : index
    %c0_4 = arith.constant 0 : index
    %2 = vector.load %arg2[%c0_2, %c0_3, %c0_4] : memref<3x80x64xbf16, #tpu.memory_space<vmem>>, vector<1x80x64xbf16>
    %3 = vector.shape_cast %2 : vector<1x80x64xbf16> to vector<80x64xbf16>
    %cst = arith.constant dense<0.000000e+00> : vector<8x64xf32>
    %4 = tpu.matmul %1, %3, %cst {dimension_numbers = #tpu.dot_dimension_numbers<[1], [0], [0], [1], [0, 0, 1, 1], [], []>} : vector<8x80xbf16>, vector<80x64xbf16>, vector<8x64xf32> -> vector<8x64xf32>
    %c0_5 = arith.constant 0 : index
    %c1 = arith.constant 1 : index
    %c0_6 = arith.constant 0 : index
    %5 = vector.load %arg1[%c0_5, %c1, %c0_6] : memref<1x10x80xbf16, #tpu.memory_space<vmem>>, vector<1x8x80xbf16>
    %6 = vector.shape_cast %5 : vector<1x8x80xbf16> to vector<8x80xbf16>
    %c1_7 = arith.constant 1 : index
    %c0_8 = arith.constant 0 : index
    %c0_9 = arith.constant 0 : index
    %7 = vector.load %arg2[%c1_7, %c0_8, %c0_9] : memref<3x80x64xbf16, #tpu.memory_space<vmem>>, vector<1x80x64xbf16>
    %8 = vector.shape_cast %7 : vector<1x80x64xbf16> to vector<80x64xbf16>
    %cst_10 = arith.constant dense<0.000000e+00> : vector<8x64xf32>
    %9 = tpu.matmul %6, %8, %cst_10 {dimension_numbers = #tpu.dot_dimension_numbers<[1], [0], [0], [1], [0, 0, 1, 1], [], []>} : vector<8x80xbf16>, vector<80x64xbf16>, vector<8x64xf32> -> vector<8x64xf32>
    %10 = arith.addf %4, %9 : vector<8x64xf32>
    %c0_11 = arith.constant 0 : index
    %c2 = arith.constant 2 : index
    %c0_12 = arith.constant 0 : index
    %11 = vector.load %arg1[%c0_11, %c2, %c0_12] : memref<1x10x80xbf16, #tpu.memory_space<vmem>>, vector<1x8x80xbf16>
    %12 = vector.shape_cast %11 : vector<1x8x80xbf16> to vector<8x80xbf16>
    %c2_13 = arith.constant 2 : index
    %c0_14 = arith.constant 0 : index
    %c0_15 = arith.constant 0 : index
    %13 = vector.load %arg2[%c2_13, %c0_14, %c0_15] : memref<3x80x64xbf16, #tpu.memory_space<vmem>>, vector<1x80x64xbf16>
    %14 = vector.shape_cast %13 : vector<1x80x64xbf16> to vector<80x64xbf16>
    %cst_16 = arith.constant dense<0.000000e+00> : vector<8x64xf32>
    %15 = tpu.matmul %12, %14, %cst_16 {dimension_numbers = #tpu.dot_dimension_numbers<[1], [0], [0], [1], [0, 0, 1, 1], [], []>} : vector<8x80xbf16>, vector<80x64xbf16>, vector<8x64xf32> -> vector<8x64xf32>
    %16 = arith.addf %10, %15 : vector<8x64xf32>
    %c0_17 = arith.constant 0 : index
    %c0_18 = arith.constant 0 : index
    %17 = vector.load %arg3[%c0_17, %c0_18] : memref<1x64xf32, #tpu.memory_space<vmem>>, vector<1x64xf32>
    %18 = vector.broadcast %17 : vector<1x64xf32> to vector<8x64xf32>
    %19 = arith.addf %16, %18 : vector<8x64xf32>
    %cst_19 = arith.constant 0.000000e+00 : f32
    %20 = vector.broadcast %cst_19 : f32 to vector<8x64xf32>
    %21 = arith.cmpf ogt, %19, %20 : vector<8x64xf32>
    %cst_20 = arith.constant 2.000000e-01 : f32
    %22 = vector.broadcast %cst_20 : f32 to vector<8x64xf32>
    %23 = arith.mulf %22, %19 : vector<8x64xf32>
    %24 = arith.select %21, %19, %23 : vector<8x64xi1>, vector<8x64xf32>
    %c0_21 = arith.constant 0 : index
    %c0_22 = arith.constant 0 : index
    %c0_23 = arith.constant 0 : index
    %25 = vector.load %arg4[%c0_21, %c0_22, %c0_23] : memref<1x8x64xf32, #tpu.memory_space<vmem>>, vector<1x8x64xf32>
    %26 = vector.shape_cast %25 : vector<1x8x64xf32> to vector<8x64xf32>
    %27 = vector.shape_cast %24 : vector<8x64xf32> to vector<1x8x64xf32>
    tpu.vector_store %arg4[%c0_21, %c0_22, %c0_23], %27 {strides = array<i32>} : memref<1x8x64xf32, #tpu.memory_space<vmem>>, vector<1x8x64xf32>,
    return
  }
  func.func @transform_0(%arg0: i32) -> (i32, i32, i32) {
    %c0_i32 = arith.constant 0 : i32
    %c0_i32_0 = arith.constant 0 : i32
    %c0_i32_1 = arith.constant 0 : i32
    return %arg0, %c0_i32, %c0_i32_0 : i32, i32, i32
  }
  func.func @transform_1(%arg0: i32) -> (i32, i32, i32) {
    %c0_i32 = arith.constant 0 : i32
    %c0_i32_0 = arith.constant 0 : i32
    %c0_i32_1 = arith.constant 0 : i32
    %c0_i32_2 = arith.constant 0 : i32
    return %c0_i32, %c0_i32_0, %c0_i32_1 : i32, i32, i32
  }
  func.func @transform_2(%arg0: i32) -> (i32, i32) {
    %c0_i32 = arith.constant 0 : i32
    %c0_i32_0 = arith.constant 0 : i32
    %c0_i32_1 = arith.constant 0 : i32
    return %c0_i32, %c0_i32_0 : i32, i32
  }
  func.func @transform_3(%arg0: i32) -> (i32, i32, i32) {
    %c0_i32 = arith.constant 0 : i32
    %c0_i32_0 = arith.constant 0 : i32
    %c0_i32_1 = arith.constant 0 : i32
    return %arg0, %c0_i32, %c0_i32_0 : i32, i32, i32
  }
}

module attributes {stable_mosaic.version = 11 : i64} {
  func.func @_conv_block_kernel(%arg0: i32, %arg1: memref<1x10x80xbf16, #tpu.memory_space<vmem>>, %arg2: memref<3x80x64xbf16, #tpu.memory_space<vmem>>, %arg3: memref<1x64xf32, #tpu.memory_space<vmem>>, %arg4: memref<1x8x64xf32, #tpu.memory_space<vmem>>, %arg5: memref<64x16xf32, #tpu.memory_space<vmem>>, %arg6: memref<1x16xf32, #tpu.memory_space<vmem>>, %arg7: memref<1x8x16xf32, #tpu.memory_space<vmem>>) attributes {dimension_semantics = [#tpu.dimension_semantics<parallel>], iteration_bounds = array<i64: 2>, scalar_prefetch = 0 : i64, scratch_operands = 0 : i64, tpu.core_type = #tpu.core_type<tc>, window_params = [{transform_indices = @transform_0, window_bounds = array<i64: 1, 10, 80>}, {pipeline_mode = #tpu.pipeline_mode<synchronous>, transform_indices = @transform_1, window_bounds = array<i64: 3, 80, 64>}, {pipeline_mode = #tpu.pipeline_mode<synchronous>, transform_indices = @transform_2, window_bounds = array<i64: 1, 64>}, {transform_indices = @transform_3, window_bounds = array<i64: 1, 8, 64>}, {pipeline_mode = #tpu.pipeline_mode<synchronous>, transform_indices = @transform_4, window_bounds = array<i64: 64, 16>}, {pipeline_mode = #tpu.pipeline_mode<synchronous>, transform_indices = @transform_5, window_bounds = array<i64: 1, 16>}, {transform_indices = @transform_6, window_bounds = array<i64: 1, 8, 16>}]} {
    %c0 = arith.constant 0 : index
    %c0_0 = arith.constant 0 : index
    %c0_1 = arith.constant 0 : index
    %0 = vector.load %arg1[%c0, %c0_0, %c0_1] : memref<1x10x80xbf16, #tpu.memory_space<vmem>>, vector<1x8x80xbf16>
    %1 = vector.shape_cast %0 : vector<1x8x80xbf16> to vector<8x80xbf16>
    %c0_2 = arith.constant 0 : index
    %c0_3 = arith.constant 0 : index
    %c0_4 = arith.constant 0 : index
    %2 = vector.load %arg2[%c0_2, %c0_3, %c0_4] : memref<3x80x64xbf16, #tpu.memory_space<vmem>>, vector<1x80x64xbf16>
    %3 = vector.shape_cast %2 : vector<1x80x64xbf16> to vector<80x64xbf16>
    %cst = arith.constant dense<0.000000e+00> : vector<8x64xf32>
    %4 = tpu.matmul %1, %3, %cst {dimension_numbers = #tpu.dot_dimension_numbers<[1], [0], [0], [1], [0, 0, 1, 1], [], []>} : vector<8x80xbf16>, vector<80x64xbf16>, vector<8x64xf32> -> vector<8x64xf32>
    %c0_5 = arith.constant 0 : index
    %c1 = arith.constant 1 : index
    %c0_6 = arith.constant 0 : index
    %5 = vector.load %arg1[%c0_5, %c1, %c0_6] : memref<1x10x80xbf16, #tpu.memory_space<vmem>>, vector<1x8x80xbf16>
    %6 = vector.shape_cast %5 : vector<1x8x80xbf16> to vector<8x80xbf16>
    %c1_7 = arith.constant 1 : index
    %c0_8 = arith.constant 0 : index
    %c0_9 = arith.constant 0 : index
    %7 = vector.load %arg2[%c1_7, %c0_8, %c0_9] : memref<3x80x64xbf16, #tpu.memory_space<vmem>>, vector<1x80x64xbf16>
    %8 = vector.shape_cast %7 : vector<1x80x64xbf16> to vector<80x64xbf16>
    %cst_10 = arith.constant dense<0.000000e+00> : vector<8x64xf32>
    %9 = tpu.matmul %6, %8, %cst_10 {dimension_numbers = #tpu.dot_dimension_numbers<[1], [0], [0], [1], [0, 0, 1, 1], [], []>} : vector<8x80xbf16>, vector<80x64xbf16>, vector<8x64xf32> -> vector<8x64xf32>
    %10 = arith.addf %4, %9 : vector<8x64xf32>
    %c0_11 = arith.constant 0 : index
    %c2 = arith.constant 2 : index
    %c0_12 = arith.constant 0 : index
    %11 = vector.load %arg1[%c0_11, %c2, %c0_12] : memref<1x10x80xbf16, #tpu.memory_space<vmem>>, vector<1x8x80xbf16>
    %12 = vector.shape_cast %11 : vector<1x8x80xbf16> to vector<8x80xbf16>
    %c2_13 = arith.constant 2 : index
    %c0_14 = arith.constant 0 : index
    %c0_15 = arith.constant 0 : index
    %13 = vector.load %arg2[%c2_13, %c0_14, %c0_15] : memref<3x80x64xbf16, #tpu.memory_space<vmem>>, vector<1x80x64xbf16>
    %14 = vector.shape_cast %13 : vector<1x80x64xbf16> to vector<80x64xbf16>
    %cst_16 = arith.constant dense<0.000000e+00> : vector<8x64xf32>
    %15 = tpu.matmul %12, %14, %cst_16 {dimension_numbers = #tpu.dot_dimension_numbers<[1], [0], [0], [1], [0, 0, 1, 1], [], []>} : vector<8x80xbf16>, vector<80x64xbf16>, vector<8x64xf32> -> vector<8x64xf32>
    %16 = arith.addf %10, %15 : vector<8x64xf32>
    %c0_17 = arith.constant 0 : index
    %c0_18 = arith.constant 0 : index
    %17 = vector.load %arg3[%c0_17, %c0_18] : memref<1x64xf32, #tpu.memory_space<vmem>>, vector<1x64xf32>
    %18 = vector.broadcast %17 : vector<1x64xf32> to vector<8x64xf32>
    %19 = arith.addf %16, %18 : vector<8x64xf32>
    %c0_19 = arith.constant 0 : index
    %c0_20 = arith.constant 0 : index
    %c0_21 = arith.constant 0 : index
    %20 = vector.load %arg4[%c0_19, %c0_20, %c0_21] : memref<1x8x64xf32, #tpu.memory_space<vmem>>, vector<1x8x64xf32>
    %21 = vector.shape_cast %20 : vector<1x8x64xf32> to vector<8x64xf32>
    %22 = arith.addf %19, %21 : vector<8x64xf32>
    %cst_22 = arith.constant 0.000000e+00 : f32
    %23 = vector.broadcast %cst_22 : f32 to vector<8x64xf32>
    %24 = arith.cmpf ogt, %22, %23 : vector<8x64xf32>
    %cst_23 = arith.constant 2.000000e-01 : f32
    %25 = vector.broadcast %cst_23 : f32 to vector<8x64xf32>
    %26 = arith.mulf %25, %22 : vector<8x64xf32>
    %27 = arith.select %24, %22, %26 : vector<8x64xi1>, vector<8x64xf32>
    %c0_24 = arith.constant 0 : index
    %c0_25 = arith.constant 0 : index
    %28 = vector.load %arg5[%c0_24, %c0_25] : memref<64x16xf32, #tpu.memory_space<vmem>>, vector<64x16xf32>
    %cst_26 = arith.constant dense<0.000000e+00> : vector<8x16xf32>
    %29 = tpu.matmul %27, %28, %cst_26 {dimension_numbers = #tpu.dot_dimension_numbers<[1], [0], [0], [1], [0, 0, 1, 1], [], []>} : vector<8x64xf32>, vector<64x16xf32>, vector<8x16xf32> -> vector<8x16xf32>
    %c0_27 = arith.constant 0 : index
    %c0_28 = arith.constant 0 : index
    %30 = vector.load %arg6[%c0_27, %c0_28] : memref<1x16xf32, #tpu.memory_space<vmem>>, vector<1x16xf32>
    %31 = vector.broadcast %30 : vector<1x16xf32> to vector<8x16xf32>
    %32 = arith.addf %29, %31 : vector<8x16xf32>
    %c0_29 = arith.constant 0 : index
    %c0_30 = arith.constant 0 : index
    %c0_31 = arith.constant 0 : index
    %33 = vector.load %arg7[%c0_29, %c0_30, %c0_31] : memref<1x8x16xf32, #tpu.memory_space<vmem>>, vector<1x8x16xf32>
    %34 = vector.shape_cast %33 : vector<1x8x16xf32> to vector<8x16xf32>
    %35 = vector.shape_cast %32 : vector<8x16xf32> to vector<1x8x16xf32>
    tpu.vector_store %arg7[%c0_29, %c0_30, %c0_31], %35 {strides = array<i32>} : memref<1x8x16xf32, #tpu.memory_space<vmem>>, vector<1x8x16xf32>,
    return
  }
  func.func @transform_0(%arg0: i32) -> (i32, i32, i32) {
    %c0_i32 = arith.constant 0 : i32
    %c0_i32_0 = arith.constant 0 : i32
    %c0_i32_1 = arith.constant 0 : i32
    return %arg0, %c0_i32, %c0_i32_0 : i32, i32, i32
  }
  func.func @transform_1(%arg0: i32) -> (i32, i32, i32) {
    %c0_i32 = arith.constant 0 : i32
    %c0_i32_0 = arith.constant 0 : i32
    %c0_i32_1 = arith.constant 0 : i32
    %c0_i32_2 = arith.constant 0 : i32
    return %c0_i32, %c0_i32_0, %c0_i32_1 : i32, i32, i32
  }
  func.func @transform_2(%arg0: i32) -> (i32, i32) {
    %c0_i32 = arith.constant 0 : i32
    %c0_i32_0 = arith.constant 0 : i32
    %c0_i32_1 = arith.constant 0 : i32
    return %c0_i32, %c0_i32_0 : i32, i32
  }
  func.func @transform_3(%arg0: i32) -> (i32, i32, i32) {
    %c0_i32 = arith.constant 0 : i32
    %c0_i32_0 = arith.constant 0 : i32
    %c0_i32_1 = arith.constant 0 : i32
    return %arg0, %c0_i32, %c0_i32_0 : i32, i32, i32
  }
  func.func @transform_4(%arg0: i32) -> (i32, i32) {
    %c0_i32 = arith.constant 0 : i32
    %c0_i32_0 = arith.constant 0 : i32
    %c0_i32_1 = arith.constant 0 : i32
    return %c0_i32, %c0_i32_0 : i32, i32
  }
  func.func @transform_5(%arg0: i32) -> (i32, i32) {
    %c0_i32 = arith.constant 0 : i32
    %c0_i32_0 = arith.constant 0 : i32
    %c0_i32_1 = arith.constant 0 : i32
    return %c0_i32, %c0_i32_0 : i32, i32
  }
  func.func @transform_6(%arg0: i32) -> (i32, i32, i32) {
    %c0_i32 = arith.constant 0 : i32
    %c0_i32_0 = arith.constant 0 : i32
    %c0_i32_1 = arith.constant 0 : i32
    return %arg0, %c0_i32, %c0_i32_0 : i32, i32, i32
  }
}

</mosaic_0001>

<bundles_post_ra>
// kernel: tile.27
= control target key start
LH: loop header
LB: loop body
LE: loop exit
PB: predicated region body
PF: predicated region fallthrough
CT: control target
= control target key end

     0   :  { %s131_s10 = smov 60   ;;  %s132_s11 = smov 52   ;;  %vm3_vm0 = vcmask 31744   ;;  %vm9_vm1 = vcmask 523744   ;;  %vm15_vm2 = vcmask 490944   ;;  %vm21_vm3 = vcmask 458144   ;;  %s207_s0 = inlined_call_operand.vmem [shape: f32[16,4], index: 0, kind: input, shape index: {}]   ;;  %s208_s1 = inlined_call_operand.vmem [shape: f32[1,64], index: 1, kind: output, shape index: {}]  }
   0x1   :  { %v101_v0 = vld [vmem:[%s207_s0 + $0xf] sm:$0x1]   ;;  %v103_v1 = vld [vmem:[%s207_s0 + $0xd] sm:$0x1]   ;;  %v102_v2 = vld [vmem:[%s207_s0 + $0xe] sm:$0x1]  }
   0x2   :  { %7 = vrot.lane.b32.xlu0 %v101_v0, %s131_s10  ;;  %19 = vrot.lane.b32.xlu1 %v103_v1, %s132_s11  ;;  %v104_v3 = vld [vmem:[%s207_s0 + $0xc] sm:$0x1]   ;;  %s133_s16 = smov 56   ;;  %s134_s17 = smov 48   ;;  %v105_v4 = vld [vmem:[%s207_s0 + $0xb] sm:$0x1]  }
   0x3   :  { %v106_v5 = vld [vmem:[%s207_s0 + $0xa] sm:$0x1]   ;;  %v2_v6 = vld [vmem:[%s207_s0] sm:$0x1]   ;;  %s135_s24 = smov 44   ;;  %s136_s25 = smov 40  }
   0x4   :  { %4 = vst.msk [vmem:[#allocation0] sm:$0x1] %vm3_vm0, %v2_v6   ;;  %v107_v7 = vld [vmem:[%s207_s0 + $0x9] sm:$0x1]   ;;  %v108_v8 = vld [vmem:[%s207_s0 + $0x8] sm:$0x1]  }
   0x5   :  { %s137_s30 = smov 36   ;;  %s138_s2 = smov 32   ;;  %v109_v9 = vld [vmem:[%s207_s0 + $0x7] sm:$0x1]   ;;  %v110_v10 = vld [vmem:[%s207_s0 + $0x6] sm:$0x1]  }
   0x6   :  { %13 = vrot.lane.b32.xlu0 %v102_v2, %s133_s16  ;;  %25 = vrot.lane.b32.xlu1 %v104_v3, %s134_s17  ;;  %s139_s7 = smov 28   ;;  %s140_s8 = smov 24   ;;  %v111_v11 = vld [vmem:[%s207_s0 + $0x5] sm:$0x1]   ;;  %v112_v12 = vld [vmem:[%s207_s0 + $0x4] sm:$0x1]  }
   0x7   :  { %s141_s13 = smov 20   ;;  %s142_s14 = smov 16   ;;  %v113_v13 = vld [vmem:[%s207_s0 + $0x3] sm:$0x1]   ;;  %v114_v14 = vld [vmem:[%s207_s0 + $0x2] sm:$0x1]  }
   0x8   :  { %s143_s19 = smov 12   ;;  %s144_s20 = smov 8   ;;  %v115_v15 = vld [vmem:[%s207_s0 + $0x1] sm:$0x1]   ;;  %vm27_vm4 = vcmask 425344   ;;  %vm33_vm5 = vcmask 392544  }
   0x9   :  { %s145_s0 = smov 4   ;;  %vm39_vm6 = vcmask 359744   ;;  %vm45_vm7 = vcmask 326944   ;;  %vm51_vm8 = vcmask 294144   ;;  %vm57_vm9 = vcmask 261344  }
   0xa   :  { %31 = vrot.lane.b32.xlu0 %v105_v4, %s135_s24  ;;  %37 = vrot.lane.b32.xlu1 %v106_v5, %s136_s25  ;;  %vm63_vm10 = vcmask 228544   ;;  %vm69_vm11 = vcmask 195744   ;;  %vm75_vm12 = vcmask 162944   ;;  %vm81_vm13 = vcmask 130144  }
   0xb   :  { %vm87_vm14 = vcmask 97344   ;;  %vm93_vm15 = vcmask 64544  }
   0xe   :  { %43 = vrot.lane.b32.xlu0 %v107_v7, %s137_s30  ;;  %49 = vrot.lane.b32.xlu1 %v108_v8, %s138_s2 }
  0x12   :  { %55 = vrot.lane.b32.xlu0 %v109_v9, %s139_s7  ;;  %61 = vrot.lane.b32.xlu1 %v110_v10, %s140_s8 }
  0x16   :  { %67 = vrot.lane.b32.xlu0 %v111_v11, %s141_s13  ;;  %73 = vrot.lane.b32.xlu1 %v112_v12, %s142_s14 }
  0x1a   :  { %79 = vrot.lane.b32.xlu0 %v113_v13, %s143_s19  ;;  %85 = vrot.lane.b32.xlu1 %v114_v14, %s144_s20 }
  0x1e   :  { %91 = vrot.lane.b32.xlu0 %v115_v15, %s145_s0 }
  0x74   :  { %v8_v16 = vpop.permute.xlu0 %7   ;;  %v20_v17 = vpop.permute.xlu1 %19  }
  0x75   :  { %10 = vst.msk [vmem:[#allocation0] sm:$0x1] %vm9_vm1, %v8_v16  }
  0x78   :  { %v14_v18 = vpop.permute.xlu0 %13   ;;  %v26_v19 = vpop.permute.xlu1 %25  }
  0x79   :  { %16 = vst.msk [vmem:[#allocation0] sm:$0x1] %vm15_vm2, %v14_v18  }
  0x7a   :  { %22 = vst.msk [vmem:[#allocation0] sm:$0x1] %vm21_vm3, %v20_v17  }
  0x7b   :  { %28 = vst.msk [vmem:[#allocation0] sm:$0x1] %vm27_vm4, %v26_v19  }
  0x7c   :  { %v32_v20 = vpop.permute.xlu0 %31   ;;  %v38_v21 = vpop.permute.xlu1 %37  }
  0x7d   :  { %34 = vst.msk [vmem:[#allocation0] sm:$0x1] %vm33_vm5, %v32_v20  }
  0x7e   :  { %40 = vst.msk [vmem:[#allocation0] sm:$0x1] %vm39_vm6, %v38_v21  }
  0x80   :  { %v44_v22 = vpop.permute.xlu0 %43   ;;  %v50_v23 = vpop.permute.xlu1 %49  }
  0x81   :  { %46 = vst.msk [vmem:[#allocation0] sm:$0x1] %vm45_vm7, %v44_v22  }
  0x82   :  { %52 = vst.msk [vmem:[#allocation0] sm:$0x1] %vm51_vm8, %v50_v23  }
  0x84   :  { %v56_v24 = vpop.permute.xlu0 %55   ;;  %v62_v25 = vpop.permute.xlu1 %61  }
  0x85   :  { %58 = vst.msk [vmem:[#allocation0] sm:$0x1] %vm57_vm9, %v56_v24  }
  0x86   :  { %64 = vst.msk [vmem:[#allocation0] sm:$0x1] %vm63_vm10, %v62_v25  }
  0x88   :  { %v68_v26 = vpop.permute.xlu0 %67   ;;  %v74_v27 = vpop.permute.xlu1 %73  }
  0x89   :  { %70 = vst.msk [vmem:[#allocation0] sm:$0x1] %vm69_vm11, %v68_v26  }
  0x8a   :  { %76 = vst.msk [vmem:[#allocation0] sm:$0x1] %vm75_vm12, %v74_v27  }
  0x8c   :  { %v80_v28 = vpop.permute.xlu0 %79   ;;  %v86_v29 = vpop.permute.xlu1 %85  }
  0x8d   :  { %82 = vst.msk [vmem:[#allocation0] sm:$0x1] %vm81_vm13, %v80_v28  }
  0x8e   :  { %88 = vst.msk [vmem:[#allocation0] sm:$0x1] %vm87_vm14, %v86_v29  }
  0x90   :  { %v92_v30 = vpop.permute.xlu0 %91  }
  0x91   :  { %94 = vst.msk [vmem:[#allocation0] sm:$0x1] %vm93_vm15, %v92_v30  }
  0x98   :  { %v98_v31 = vld [vmem:[#allocation0] sm:$0x1] }
  0x99   :  { %100 = vst [vmem:[%s208_s1] sm:$0x1] %v98_v31 }

// kernel: tile.30
= control target key start
LH: loop header
LB: loop body
LE: loop exit
PB: predicated region body
PF: predicated region fallthrough
CT: control target
= control target key end

     0   :  { %s28_s0 = inlined_call_operand.vmem [shape: f32[8], index: 0, kind: input, shape index: {}]   ;;  %s29_s1 = inlined_call_operand.vmem [shape: f32[16,8], index: 1, kind: output, shape index: {}]  }
   0x1   :  { %v4_v0 = vld [vmem:[%s28_s0] ss:$0 sm:$0xff] }
   0x2   :  { %5 = vst [vmem:[%s29_s1] sm:$0xff] %v4_v0  ;;  %8 = vst [vmem:[%s29_s1 + $0x8] sm:$0xff] %v4_v0 }

// kernel: tile.31
= control target key start
LH: loop header
LB: loop body
LE: loop exit
PB: predicated region body
PF: predicated region fallthrough
CT: control target
= control target key end

     0   :  { %s131_s10 = smov 120   ;;  %s132_s11 = smov 104   ;;  %vm3_vm0 = vcmask 64512   ;;  %vm9_vm1 = vcmask 1048512   ;;  %vm15_vm2 = vcmask 982912   ;;  %vm21_vm3 = vcmask 917312   ;;  %s207_s0 = inlined_call_operand.vmem [shape: f32[16,8], index: 0, kind: input, shape index: {}]   ;;  %s208_s1 = inlined_call_operand.vmem [shape: f32[1,128], index: 1, kind: output, shape index: {}]  }
   0x1   :  { %v101_v0 = vld [vmem:[%s207_s0 + $0xf] sm:$0x1]   ;;  %v103_v1 = vld [vmem:[%s207_s0 + $0xd] sm:$0x1]   ;;  %v102_v2 = vld [vmem:[%s207_s0 + $0xe] sm:$0x1]  }
   0x2   :  { %7 = vrot.lane.b32.xlu0 %v101_v0, %s131_s10  ;;  %19 = vrot.lane.b32.xlu1 %v103_v1, %s132_s11  ;;  %v104_v3 = vld [vmem:[%s207_s0 + $0xc] sm:$0x1]   ;;  %s133_s16 = smov 112   ;;  %s134_s17 = smov 96   ;;  %v105_v4 = vld [vmem:[%s207_s0 + $0xb] sm:$0x1]  }
   0x3   :  { %v106_v5 = vld [vmem:[%s207_s0 + $0xa] sm:$0x1]   ;;  %v2_v6 = vld [vmem:[%s207_s0] sm:$0x1]   ;;  %s135_s24 = smov 88   ;;  %s136_s25 = smov 80  }
   0x4   :  { %4 = vst.msk [vmem:[#allocation0] sm:$0x1] %vm3_vm0, %v2_v6   ;;  %v107_v7 = vld [vmem:[%s207_s0 + $0x9] sm:$0x1]   ;;  %v108_v8 = vld [vmem:[%s207_s0 + $0x8] sm:$0x1]  }
   0x5   :  { %s137_s30 = smov 72   ;;  %s138_s2 = smov 64   ;;  %v109_v9 = vld [vmem:[%s207_s0 + $0x7] sm:$0x1]   ;;  %v110_v10 = vld [vmem:[%s207_s0 + $0x6] sm:$0x1]  }
   0x6   :  { %13 = vrot.lane.b32.xlu0 %v102_v2, %s133_s16  ;;  %25 = vrot.lane.b32.xlu1 %v104_v3, %s134_s17  ;;  %s139_s7 = smov 56   ;;  %s140_s8 = smov 48   ;;  %v111_v11 = vld [vmem:[%s207_s0 + $0x5] sm:$0x1]   ;;  %v112_v12 = vld [vmem:[%s207_s0 + $0x4] sm:$0x1]  }
   0x7   :  { %s141_s13 = smov 40   ;;  %s142_s14 = smov 32   ;;  %v113_v13 = vld [vmem:[%s207_s0 + $0x3] sm:$0x1]   ;;  %v114_v14 = vld [vmem:[%s207_s0 + $0x2] sm:$0x1]  }
   0x8   :  { %s143_s19 = smov 24   ;;  %s144_s20 = smov 16   ;;  %v115_v15 = vld [vmem:[%s207_s0 + $0x1] sm:$0x1]   ;;  %vm27_vm4 = vcmask 851712   ;;  %vm33_vm5 = vcmask 786112  }
   0x9   :  { %s145_s0 = smov 8   ;;  %vm39_vm6 = vcmask 720512   ;;  %vm45_vm7 = vcmask 654912   ;;  %vm51_vm8 = vcmask 589312   ;;  %vm57_vm9 = vcmask 523712  }
   0xa   :  { %31 = vrot.lane.b32.xlu0 %v105_v4, %s135_s24  ;;  %37 = vrot.lane.b32.xlu1 %v106_v5, %s136_s25  ;;  %vm63_vm10 = vcmask 458112   ;;  %vm69_vm11 = vcmask 392512   ;;  %vm75_vm12 = vcmask 326912   ;;  %vm81_vm13 = vcmask 261312  }
   0xb   :  { %vm87_vm14 = vcmask 195712   ;;  %vm93_vm15 = vcmask 130112  }
   0xe   :  { %43 = vrot.lane.b32.xlu0 %v107_v7, %s137_s30  ;;  %49 = vrot.lane.b32.xlu1 %v108_v8, %s138_s2 }
  0x12   :  { %55 = vrot.lane.b32.xlu0 %v109_v9, %s139_s7  ;;  %61 = vrot.lane.b32.xlu1 %v110_v10, %s140_s8 }
  0x16   :  { %67 = vrot.lane.b32.xlu0 %v111_v11, %s141_s13  ;;  %73 = vrot.lane.b32.xlu1 %v112_v12, %s142_s14 }
  0x1a   :  { %79 = vrot.lane.b32.xlu0 %v113_v13, %s143_s19  ;;  %85 = vrot.lane.b32.xlu1 %v114_v14, %s144_s20 }
  0x1e   :  { %91 = vrot.lane.b32.xlu0 %v115_v15, %s145_s0 }
  0x74   :  { %v8_v16 = vpop.permute.xlu0 %7   ;;  %v20_v17 = vpop.permute.xlu1 %19  }
  0x75   :  { %10 = vst.msk [vmem:[#allocation0] sm:$0x1] %vm9_vm1, %v8_v16  }
  0x78   :  { %v14_v18 = vpop.permute.xlu0 %13   ;;  %v26_v19 = vpop.permute.xlu1 %25  }
  0x79   :  { %16 = vst.msk [vmem:[#allocation0] sm:$0x1] %vm15_vm2, %v14_v18  }
  0x7a   :  { %22 = vst.msk [vmem:[#allocation0] sm:$0x1] %vm21_vm3, %v20_v17  }
  0x7b   :  { %28 = vst.msk [vmem:[#allocation0] sm:$0x1] %vm27_vm4, %v26_v19  }
  0x7c   :  { %v32_v20 = vpop.permute.xlu0 %31   ;;  %v38_v21 = vpop.permute.xlu1 %37  }
  0x7d   :  { %34 = vst.msk [vmem:[#allocation0] sm:$0x1] %vm33_vm5, %v32_v20  }
  0x7e   :  { %40 = vst.msk [vmem:[#allocation0] sm:$0x1] %vm39_vm6, %v38_v21  }
  0x80   :  { %v44_v22 = vpop.permute.xlu0 %43   ;;  %v50_v23 = vpop.permute.xlu1 %49  }
  0x81   :  { %46 = vst.msk [vmem:[#allocation0] sm:$0x1] %vm45_vm7, %v44_v22  }
  0x82   :  { %52 = vst.msk [vmem:[#allocation0] sm:$0x1] %vm51_vm8, %v50_v23  }
  0x84   :  { %v56_v24 = vpop.permute.xlu0 %55   ;;  %v62_v25 = vpop.permute.xlu1 %61  }
  0x85   :  { %58 = vst.msk [vmem:[#allocation0] sm:$0x1] %vm57_vm9, %v56_v24  }
  0x86   :  { %64 = vst.msk [vmem:[#allocation0] sm:$0x1] %vm63_vm10, %v62_v25  }
  0x88   :  { %v68_v26 = vpop.permute.xlu0 %67   ;;  %v74_v27 = vpop.permute.xlu1 %73  }
  0x89   :  { %70 = vst.msk [vmem:[#allocation0] sm:$0x1] %vm69_vm11, %v68_v26  }
  0x8a   :  { %76 = vst.msk [vmem:[#allocation0] sm:$0x1] %vm75_vm12, %v74_v27  }
  0x8c   :  { %v80_v28 = vpop.permute.xlu0 %79   ;;  %v86_v29 = vpop.permute.xlu1 %85  }
  0x8d   :  { %82 = vst.msk [vmem:[#allocation0] sm:$0x1] %vm81_vm13, %v80_v28  }
  0x8e   :  { %88 = vst.msk [vmem:[#allocation0] sm:$0x1] %vm87_vm14, %v86_v29  }
  0x90   :  { %v92_v30 = vpop.permute.xlu0 %91  }
  0x91   :  { %94 = vst.msk [vmem:[#allocation0] sm:$0x1] %vm93_vm15, %v92_v30  }
  0x98   :  { %v98_v31 = vld [vmem:[#allocation0] sm:$0x1] }
  0x99   :  { %100 = vst [vmem:[%s208_s1] sm:$0x1] %v98_v31 }

// kernel: _lambda_.5
= control target key start
LH: loop header
LB: loop body
LE: loop exit
PB: predicated region body
PF: predicated region fallthrough
CT: control target
= control target key end

     0   :  { %s572_s12 = smov 0   ;;  %s623_s0 = inlined_call_operand.vmem [shape: bf16[2,18,18], index: 0, kind: input, shape index: {}]   ;;  %s624_s1 = inlined_call_operand.vmem [shape: bf16[3,18,64], index: 1, kind: input, shape index: {}]   ;;  %s625_s2 = inlined_call_operand.vmem [shape: f32[1,64], index: 2, kind: input, shape index: {}]   ;;  %s626_s3 = inlined_call_operand.vmem [shape: f32[2,16,64], index: 3, kind: output, shape index: {}]  }
   0x1 LB: > { %s459_s13 = sadd.s32 4294967295, %s548_s12   ;;  %p463_p0 = scmp.ge.s32.totalorder %s548_s12, 1  ;;  %s548_s12 = sphi %s572_s12, %s13_s12  }
   0x2   : > { %p137_p1 = scmp.lt.s32.totalorder %s548_s12, 3 }
   0x4   : > { %p138_p2 = pnand %p463_p0, %p137_p1 }
   0x5   : > { %v533_v0 = vld [vmem:[%s624_s1 + $0xc] sm:$0xff] (!%p138_p2)   ;;  %v550_v1 = vmov (!%p138_p2), 0.0   ;;  %v534_v2 = vld [vmem:[%s624_s1] sm:$0xff] (!%p138_p2)   ;;  %vm216_vm0 = vcmask (!%p138_p2), 1040384   ;;  %p161_p3 = scmp.lt.s32.totalorder (!%p138_p2), %s459_s13, 1  ;;  %vm551_vm1 = vmmov (!%p138_p2), 0  }
   0x6   : > { %141 = sbr.rel (%p138_p2) target bundleno = 257 (0x101), region = 32  ;;  %498 = vmatprep.subr.bf16.mxu0 (!%p138_p2), %v550_v1  ;;  %506 = vmatprep.subr.bf16.mxu1 (!%p138_p2), %v550_v1  ;;  %v535_v3 = vld [vmem:[%s624_s1 + $0x14] ss:$0 sps:$4 sm:$0x11] (!%p138_p2)   ;;  %vm212_vm2 = vcmask (!%p138_p2), 146432   ;;  %v539_v18 = vld [vmem:[%s624_s1 + $0x18] sm:$0xff] (!%p138_p2)  }
   0x7   : > { %499 = vmatpush3.bf16.msra.mxu0 (!%p138_p2), %v533_v0  ;;  %507 = vmatpush3.bf16.msra.mxu1 (!%p138_p2), %v534_v2  ;;  %v536_v4 = vld [vmem:[%s624_s1 + $0x8] ss:$0 sps:$4 sm:$0x11] (!%p138_p2)   ;;  %v218_v5 = vsel (!%p138_p2), %vm216_vm0, %v535_v3, 0  ;;  %vm190_vm3 = vsmask.f32 (!%p138_p2), 7424 }
   0x8   : > { %500 = vmatprep.subr.bf16.mxu0 (!%p138_p2), %v550_v1  ;;  %508 = vmatprep.subr.bf16.mxu1 (!%p138_p2), %v550_v1  ;;  %v273_v6 = vsel (!%p138_p2), %vm216_vm0, %v536_v4, 0  ;;  %v540_v20 = vld [vmem:[%s624_s1 + $0x20] ss:$0 sps:$4 sm:$0x11] (!%p138_p2)   ;;  %vm324_vm4 = vcmask (!%p138_p2), 1046528   ;;  %vm401_vm6 = vcmask (!%p138_p2), 523264  }
   0x9   : > { %502 = vmatprep.mubr.msk.bf16.mxu0 (!%p138_p2), %vm551_vm1, %v550_v1  ;;  %510 = vmatprep.mubr.msk.bf16.mxu1 (!%p138_p2), %vm551_vm1, %v550_v1  ;;  %v341_v24 = vsel (!%p138_p2), %vm216_vm0, %v540_v20, 0  ;;  %v485_v37 = vld [vmem:[%s625_s2] ss:$0 sm:$0xff] (!%p138_p2) }
   0xb   : > { %501 = vmatpush3.bf16.msra.mxu0 (!%p138_p2), %v218_v5  ;;  %509 = vmatpush3.bf16.msra.mxu1 (!%p138_p2), %v273_v6 }
   0xc   : > { %514 = vmatprep.subr.bf16.mxu0 (!%p138_p2), %v550_v1 }
   0xd   : > { %s628_s13 = smov (!%p161_p3, %s459_s13), 1 }
   0xe   : > { %s522_s22 = smul.u32 12, %s628_s13  ;;  %s488_s5 = sshll.u32 %s628_s13, 4 }
   0xf   : > { %s170_s8 = scalar_lea.vmem %s626_s3, %s488_s5 }
  0x10   : > { %s165_s25 = scalar_lea.vmem %s623_s0, %s522_s22 }
  0x11   : > { %v172_v7 = vld [vmem:[%s165_s25] sm:$0xf]  ;;  %v173_v8 = vld [vmem:[%s165_s25 + $0x4] sm:$0xf] }
  0x12   : > { %v470_v9 = vcombine.low %v172_v7, %v173_v8  ;;  %v538_v10 = vld [vmem:[%s165_s25 + $0x8] ss:$0 sps:$4 sm:$0x11]   ;;  %v316_v14 = vld [vmem:[%s165_s25] sm:$0xe] }
  0x13   : > { %v199_v13 = vshll.u32 %v538_v10, 16  ;;  %v481_v19 = vcombine.low %v316_v14, %v173_v8  ;;  %v326_v23 = vrot.slane %v538_v10, 1 }
  0x14   : > { %v192_v11 = vshrl.u32 %v470_v9, 16  ;;  %v194_v12 = vshll.u32 %v470_v9, 16  ;;  %511 = vmatmul.mubr.msk.bf16.vlgmr.msra.gmra.mrb[0].mxu1 %vm212_vm2, %v470_v9 }
  0x15   : > { %v201_v16 = vrot.slane %v199_v13, 1  ;;  %v325_v22 = vrot.slane %v481_v19, 1 }
  0x16   : > { %v196_v15 = vrot.slane %v194_v12, 1 }
  0x17   : > { %v327_v25 = vsel %vm324_vm4, %v325_v22, %v326_v23 }
  0x18   : > { %v197_v17 = vor.u32 %v196_v15, %v192_v11 }
  0x1a   : > { %v202_v21 = vsel %vm190_vm3, %v197_v17, %v201_v16 }
  0x1b   : > { %503 = vmatmul.mubr.msk.bf16.vlgmr.msra.gmra.mrb[0].mxu0 %vm212_vm2, %v202_v21 }
  0x1c   : > { %515 = vmatpush3.bf16.msra.mxu0 %v539_v18  ;;  %518 = vmatprep.mubr.msk.bf16.mxu0 %vm551_vm1, %v550_v1 }
  0x1d   : > { %516 = vmatprep.subr.bf16.mxu0 %v550_v1 }
  0x20   : > { %517 = vmatpush3.bf16.msra.mxu0 %v341_v24 }
  0x23   : > { %519 = vmatmul.mubr.msk.bf16.vlgmr.msra.gmra.mrb[4].mxu0 %vm212_vm2, %v327_v25 }
  0xe7   : > { %v309_v26 = vpop.f32.mrb[0].mxu1 }
  0xe8   : > { %v512_v27 = vpop.f32.mrb[1].mxu1 }
  0xe9   : > { %v312_v28 = vpop.f32.mrb[2].mxu1 }
  0xea   : > { %v513_v29 = vpop.f32.mrb[3].mxu1 }
  0xee   : > { %v254_v30 = vpop.f32.mrb[0].mxu0 }
  0xef   : > { %v310_v31 = vadd.f32 %v309_v26, %v254_v30  ;;  %v504_v32 = vpop.f32.mrb[1].mxu0 }
  0xf0   : > { %v257_v33 = vpop.f32.mrb[2].mxu0 }
  0xf1   : > { %v313_v34 = vadd.f32 %v312_v28, %v257_v33  ;;  %v505_v35 = vpop.f32.mrb[3].mxu0 }
  0xf6   : > { %v377_v36 = vpop.f32.mrb[4].mxu0 }
  0xf7   : > { %v384_v38 = vadd.f32 %v377_v36, %v310_v31  ;;  %v520_v39 = vpop.f32.mrb[5].mxu0 }
  0xf8   : > { %v380_v40 = vpop.f32.mrb[6].mxu0 }
  0xf9   : > { %v393_v41 = vadd.f32 %v485_v37, %v384_v38  ;;  %v385_v42 = vadd.f32 %v380_v40, %v313_v34  ;;  %v521_v43 = vpop.f32.mrb[7].mxu0 }
  0xfb   : > { %vm395_vm5 = vcmp.gt.f32.partialorder %v393_v41, 0.0  ;;  %v397_v44 = vmul.f32 0.2, %v393_v41  ;;  %v394_v45 = vadd.f32 %v485_v37, %v385_v42 }
  0xfd   : > { %v399_v46 = vsel %vm395_vm5, %v393_v41, %v397_v44  ;;  %vm396_vm7 = vcmp.gt.f32.partialorder %v394_v45, 0.0  ;;  %v398_v47 = vmul.f32 0.2, %v394_v45 }
  0xfe   : > { %402 = vst.msk [vmem:[%s170_s8] sm:$0xff] %vm401_vm6, %v399_v46 }
  0xff   : > { %v400_v48 = vsel %vm396_vm7, %v394_v45, %v398_v47 }
 0x100   : > { %403 = vst.msk [vmem:[%s170_s8 + $0x8] sm:$0xff] %vm401_vm6, %v400_v48 }
 0x101 PF: > { %s13_s12 = sadd.s32 1, %s548_s12  }
 0x102   : > { %p10_p4 = scmp.ge.s32.totalorder %s13_s12, 4  }
 0x104   :  { %12 = sbr.rel (!%p10_p4) target bundleno = 1 (0x1), region = 64 }

// kernel: _lambda_.6
= control target key start
LH: loop header
LB: loop body
LE: loop exit
PB: predicated region body
PF: predicated region fallthrough
CT: control target
= control target key end

     0   :  { %s1011_s18 = smov 0   ;;  %s1168_s0 = inlined_call_operand.vmem [shape: bf16[2,18,72], index: 0, kind: input, shape index: {}]   ;;  %s1169_s1 = inlined_call_operand.vmem [shape: bf16[3,72,128], index: 1, kind: input, shape index: {}]   ;;  %s1170_s2 = inlined_call_operand.vmem [shape: f32[1,128], index: 2, kind: input, shape index: {}]   ;;  %s1171_s3 = inlined_call_operand.vmem [shape: f32[8,16], index: 3, kind: input, shape index: {}]   ;;  %s1172_s4 = inlined_call_operand.vmem [shape: f32[128,64], index: 4, kind: input, shape index: {}]   ;;  %s1173_s5 = inlined_call_operand.vmem [shape: f32[2,8,64], index: 5, kind: output, shape index: {}]  }
   0x1 LB: > { %s741_s19 = sadd.s32 4294967295, %s976_s18   ;;  %p745_p0 = scmp.ge.s32.totalorder %s976_s18, 1  ;;  %s976_s18 = sphi %s1011_s18, %s15_s18  }
   0x2   : > { %p187_p1 = scmp.lt.s32.totalorder %s976_s18, 3 }
   0x4   : > { %p188_p2 = pnand %p745_p0, %p187_p1 }
   0x5   : > { %v952_v0 = vld [vmem:[%s1169_s1 + $0x24] sm:$0xff] (!%p188_p2)   ;;  %v978_v1 = vmov (!%p188_p2), 0.0   ;;  %v954_v3 = vld [vmem:[%s1169_s1 + $0x2c] sm:$0xff] (!%p188_p2)   ;;  %p214_p3 = scmp.lt.s32.totalorder (!%p188_p2), %s741_s19, 1  ;;  %vm979_vm0 = vmmov (!%p188_p2), 0   ;;  %v956_v5 = vld [vmem:[%s1169_s1 + $0x34] sm:$0xff] (!%p188_p2)  }
   0x6   : > { %191 = sbr.rel (%p188_p2) target bundleno = 698 (0x2ba), region = 40  ;;  %829 = vmatprep.subr.bf16.mxu0 (!%p188_p2), %v978_v1  ;;  %843 = vmatprep.subr.bf16.mxu1 (!%p188_p2), %v978_v1  ;;  %v953_v2 = vld [vmem:[%s1169_s1] sm:$0xff] (!%p188_p2)   ;;  %v955_v4 = vld [vmem:[%s1169_s1 + $0x8] sm:$0xff] (!%p188_p2)   ;;  %v957_v6 = vld [vmem:[%s1169_s1 + $0x10] sm:$0xff] (!%p188_p2)   ;;  %vm298_vm1 = vcmask (!%p188_p2), 1043456   ;;  %vm294_vm3 = vcmask (!%p188_p2), 588800  }
   0x7   : > { %830 = vmatpush3.bf16.msra.mxu0 (!%p188_p2), %v952_v0  ;;  %844 = vmatpush3.bf16.msra.mxu1 (!%p188_p2), %v953_v2  ;;  %v958_v7 = vld [vmem:[%s1169_s1 + $0x3c] sm:$0xff] (!%p188_p2)   ;;  %v960_v8 = vld [vmem:[%s1169_s1 + $0x44] ss:$0 sps:$4 sm:$0xff] (!%p188_p2)   ;;  %vm254_vm2 = vsmask.f32 (!%p188_p2), 7424  ;;  %v964_v23 = vld [vmem:[%s1169_s1 + $0x48] sm:$0xff] (!%p188_p2)  }
   0x8   : > { %831 = vmatprep.subr.bf16.mxu0 (!%p188_p2), %v978_v1  ;;  %845 = vmatprep.subr.bf16.mxu1 (!%p188_p2), %v978_v1  ;;  %v961_v9 = vld [vmem:[%s1169_s1 + $0x20] ss:$0 sps:$4 sm:$0xff] (!%p188_p2)   ;;  %v959_v12 = vld [vmem:[%s1169_s1 + $0x18] sm:$0xff] (!%p188_p2)   ;;  %v300_v18 = vsel (!%p188_p2), %vm298_vm1, %v960_v8, 0  ;;  %v965_v25 = vld [vmem:[%s1169_s1 + $0x50] sm:$0xff] (!%p188_p2)   ;;  %vm430_vm4 = vcmask (!%p188_p2), 1046528  }
   0x9   : > { %839 = vmatprep.mubr.msk.bf16.mxu0 (!%p188_p2), %vm979_vm0, %v978_v1  ;;  %853 = vmatprep.mubr.msk.bf16.mxu1 (!%p188_p2), %vm979_vm0, %v978_v1  ;;  %v373_v21 = vsel (!%p188_p2), %vm298_vm1, %v961_v9, 0  ;;  %v966_v26 = vld [vmem:[%s1169_s1 + $0x58] sm:$0xff] (!%p188_p2)   ;;  %v967_v28 = vld [vmem:[%s1169_s1 + $0x60] sm:$0xff] (!%p188_p2)   ;;  %v968_v30 = vld [vmem:[%s1169_s1 + $0x68] ss:$0 sps:$4 sm:$0xff] (!%p188_p2)   ;;  %v980_v35 = vmov (!%p188_p2), 0.0|0.0  }
   0xa   : > { %v465_v33 = vsel (!%p188_p2), %vm298_vm1, %v968_v30, 0  ;;  %v600_v36 = vld [vmem:[%s1172_s4] sm:$0xff] (!%p188_p2)  ;;  %v601_v37 = vld [vmem:[%s1172_s4 + $0x8] sm:$0xff] (!%p188_p2)  ;;  %v602_v38 = vld [vmem:[%s1172_s4 + $0x10] sm:$0xff] (!%p188_p2)  ;;  %vm526_vm7 = vcmask (!%p188_p2), 130048   ;;  %vm686_vm8 = vcmask (!%p188_p2), 523264  }
   0xb   : > { %832 = vmatpush3.bf16.msra.mxu0 (!%p188_p2), %v954_v3  ;;  %846 = vmatpush3.bf16.msra.mxu1 (!%p188_p2), %v955_v4  ;;  %v917_v39 = vpack.c.bf16 (!%p188_p2), %v601_v37, %v600_v36  ;;  %v603_v40 = vld [vmem:[%s1172_s4 + $0x18] sm:$0xff] (!%p188_p2)  ;;  %v604_v42 = vld [vmem:[%s1172_s4 + $0x20] sm:$0xff] (!%p188_p2)  ;;  %v605_v43 = vld [vmem:[%s1172_s4 + $0x28] sm:$0xff] (!%p188_p2) }
   0xc   : > { %833 = vmatprep.subr.bf16.mxu0 (!%p188_p2), %v978_v1  ;;  %847 = vmatprep.subr.bf16.mxu1 (!%p188_p2), %v978_v1  ;;  %v920_v41 = vpack.c.bf16 (!%p188_p2), %v603_v40, %v602_v38  ;;  %v923_v44 = vpack.c.bf16 (!%p188_p2), %v605_v43, %v604_v42  ;;  %v606_v45 = vld [vmem:[%s1172_s4 + $0x30] sm:$0xff] (!%p188_p2)  ;;  %v607_v46 = vld [vmem:[%s1172_s4 + $0x38] sm:$0xff] (!%p188_p2)  ;;  %v608_v48 = vld [vmem:[%s1172_s4 + $0x40] sm:$0xff] (!%p188_p2) }
   0xd   : > { %s1175_s19 = smov (!%p214_p3, %s741_s19), 1  ;;  %v926_v47 = vpack.c.bf16 %v607_v46, %v606_v45  ;;  %v609_v49 = vld [vmem:[%s1172_s4 + $0x48] sm:$0xff]  ;;  %v610_v51 = vld [vmem:[%s1172_s4 + $0x50] sm:$0xff]  ;;  %v611_v52 = vld [vmem:[%s1172_s4 + $0x58] sm:$0xff] }
   0xe   : > { %s940_s7 = smul.u32 12, %s1175_s19  ;;  %v929_v50 = vpack.c.bf16 %v609_v49, %v608_v48  ;;  %v932_v53 = vpack.c.bf16 %v611_v52, %v610_v51  ;;  %v612_v54 = vld [vmem:[%s1172_s4 + $0x60] sm:$0xff]  ;;  %v613_v55 = vld [vmem:[%s1172_s4 + $0x68] sm:$0xff]  ;;  %v614_v57 = vld [vmem:[%s1172_s4 + $0x70] sm:$0xff]  ;;  %s747_s21 = sshll.u32 %s1175_s19, 3 }
   0xf   : > { %834 = vmatpush3.bf16.msra.mxu0 %v956_v5  ;;  %848 = vmatpush3.bf16.msra.mxu1 %v957_v6  ;;  %v935_v56 = vpack.c.bf16 %v613_v55, %v612_v54  ;;  %v615_v58 = vld [vmem:[%s1172_s4 + $0x78] sm:$0xff]  ;;  %s222_s24 = scalar_lea.vmem %s1173_s5, %s747_s21 }
  0x10   : > { %s1059_s14 = scalar_lea.vmem %s1168_s0, %s940_s7  ;;  %835 = vmatprep.subr.bf16.mxu0 %v978_v1  ;;  %849 = vmatprep.subr.bf16.mxu1 %v978_v1  ;;  %v938_v59 = vpack.c.bf16 %v615_v58, %v614_v57 }
  0x11   : > { %v224_v10 = vld [vmem:[%s1059_s14] sm:$0xf]  ;;  %v225_v11 = vld [vmem:[%s1059_s14 + $0x4] sm:$0xf] }
  0x12   : > { %v757_v13 = vcombine.low %v224_v10, %v225_v11  ;;  %v963_v14 = vld [vmem:[%s1059_s14 + $0x8] ss:$0 sps:$4 sm:$0x11]   ;;  %v416_v27 = vld [vmem:[%s1059_s14] sm:$0xe] }
  0x13   : > { %v263_v17 = vshll.u32 %v963_v14, 16  ;;  %836 = vmatpush3.bf16.msra.mxu0 %v958_v7  ;;  %850 = vmatpush3.bf16.msra.mxu1 %v959_v12  ;;  %v780_v29 = vcombine.low %v416_v27, %v225_v11  ;;  %v432_v32 = vrot.slane %v963_v14, 1  ;;  %v787_v7 = vld [vmem:[%s1170_s2] ss:$0 sm:$0xff] }
  0x14   : > { %v256_v15 = vshrl.u32 %v757_v13, 16  ;;  %v258_v16 = vshll.u32 %v757_v13, 16  ;;  %837 = vmatprep.subr.bf16.mxu0 %v978_v1  ;;  %851 = vmatprep.subr.bf16.mxu1 %v978_v1 }
  0x15   : > { %v265_v20 = vrot.slane %v263_v17, 1  ;;  %v431_v31 = vrot.slane %v780_v29, 1 }
  0x16   : > { %v260_v19 = vrot.slane %v258_v16, 1 }
  0x17   : > { %838 = vmatpush3.bf16.msra.mxu0 %v300_v18  ;;  %852 = vmatpush3.bf16.msra.mxu1 %v373_v21  ;;  %v433_v34 = vsel %vm430_vm4, %v431_v31, %v432_v32 }
  0x18   : > { %v261_v22 = vor.u32 %v260_v19, %v256_v15  ;;  %857 = vmatprep.subr.bf16.mxu0 %v978_v1  ;;  %916 = vmatprep.subr.bf16.mxu1 %v980_v35 }
  0x1a   : > { %v266_v24 = vsel %vm254_vm2, %v261_v22, %v265_v20  ;;  %854 = vmatmul.mubr.msk.bf16.vlgmr.msra.gmra.mrb[0].mxu1 %vm294_vm3, %v757_v13  ;;  %v525_v20 = vld [vmem:[%s1171_s3] sm:$0xff] }
  0x1b   : > { %840 = vmatmul.mubr.msk.bf16.vlgmr.msra.gmra.mrb[0].mxu0 %vm294_vm3, %v266_v24  ;;  %910 = vmatprep.mubr.msk.f32.mxu1 %vm979_vm0, %v978_v1 }
  0x1c   : > { %858 = vmatpush3.bf16.msra.mxu0 %v964_v23  ;;  %867 = vmatprep.mubr.msk.bf16.mxu0 %vm979_vm0, %v978_v1 }
  0x1d   : > { %859 = vmatprep.subr.bf16.mxu0 %v978_v1  ;;  %918 = vmatpush3.bf16.msra.mxu1 %v917_v39 }
  0x1e   : > { %919 = vmatprep.subr.bf16.mxu1 %v980_v35 }
  0x20   : > { %860 = vmatpush3.bf16.msra.mxu0 %v965_v25 }
  0x21   : > { %861 = vmatprep.subr.bf16.mxu0 %v978_v1  ;;  %921 = vmatpush3.bf16.msra.mxu1 %v920_v41 }
  0x22   : > { %922 = vmatprep.subr.bf16.mxu1 %v980_v35 }
  0x24   : > { %862 = vmatpush3.bf16.msra.mxu0 %v966_v26 }
  0x25   : > { %863 = vmatprep.subr.bf16.mxu0 %v978_v1  ;;  %924 = vmatpush3.bf16.msra.mxu1 %v923_v44 }
  0x26   : > { %925 = vmatprep.subr.bf16.mxu1 %v980_v35 }
  0x28   : > { %864 = vmatpush3.bf16.msra.mxu0 %v967_v28 }
  0x29   : > { %865 = vmatprep.subr.bf16.mxu0 %v978_v1  ;;  %927 = vmatpush3.bf16.msra.mxu1 %v926_v47 }
  0x2a   : > { %928 = vmatprep.subr.bf16.mxu1 %v980_v35 }
  0x2c   : > { %866 = vmatpush3.bf16.msra.mxu0 %v465_v33 }
  0x2d   : > { %913 = vmatprep.subr.bf16.mxu0 %v980_v35  ;;  %930 = vmatpush3.bf16.msra.mxu1 %v929_v50 }
  0x2e   : > { %931 = vmatprep.subr.bf16.mxu1 %v980_v35 }
  0x2f   : > { %868 = vmatmul.mubr.msk.bf16.vlgmr.msra.gmra.mrb[4].mxu0 %vm294_vm3, %v433_v34 }
  0x30   : > { %875 = vmatprep.mubr.msk.f32.mxu0 %vm979_vm0, %v978_v1 }
  0x31   : > { %933 = vmatpush3.bf16.msra.mxu1 %v932_v53 }
  0x32   : > { %934 = vmatprep.subr.bf16.mxu1 %v980_v35 }
  0x35   : > { %936 = vmatpush3.bf16.msra.mxu1 %v935_v56 }
  0x36   : > { %937 = vmatprep.subr.bf16.mxu1 %v980_v35 }
  0x39   : > { %939 = vmatpush3.bf16.msra.mxu1 %v938_v59 }
  0xed   : > { %v409_v61 = vpop.f32.mrb[0].mxu1 }
  0xee   : > { %v336_v60 = vpop.f32.mrb[0].mxu0  ;;  %v855_v0 = vpop.f32.mrb[1].mxu1 }
  0xef   : > { %v841_v62 = vpop.f32.mrb[1].mxu0  ;;  %v410_v63 = vadd.f32 %v409_v61, %v336_v60  ;;  %v412_v2 = vpop.f32.mrb[2].mxu1 }
  0xf0   : > { %v339_v1 = vpop.f32.mrb[2].mxu0  ;;  %v856_v5 = vpop.f32.mrb[3].mxu1 }
  0xf1   : > { %v842_v3 = vpop.f32.mrb[3].mxu0  ;;  %v413_v4 = vadd.f32 %v412_v2, %v339_v1 }
 0x102   : > { %v501_v6 = vpop.f32.mrb[4].mxu0 }
 0x103   : > { %v508_v8 = vadd.f32 %v501_v6, %v410_v63  ;;  %v869_v9 = vpop.f32.mrb[5].mxu0 }
 0x104   : > { %v504_v10 = vpop.f32.mrb[6].mxu0 }
 0x105   : > { %v517_v11 = vadd.f32 %v787_v7, %v508_v8  ;;  %v509_v12 = vadd.f32 %v504_v10, %v413_v4  ;;  %v870_v13 = vpop.f32.mrb[7].mxu0 }
 0x107   : > { %v521_v14 = vmul.f32 0.2, %v517_v11  ;;  %v518_v15 = vadd.f32 %v787_v7, %v509_v12  ;;  %vm519_vm5 = vcmp.gt.f32.partialorder %v517_v11, 0.0 }
 0x109   : > { %vm520_vm6 = vcmp.gt.f32.partialorder %v518_v15, 0.0  ;;  %v522_v16 = vmul.f32 0.2, %v518_v15  ;;  %v523_v17 = vsel %vm519_vm5, %v517_v11, %v521_v14 }
 0x10b   : > { %v524_v18 = vsel %vm520_vm6, %v518_v15, %v522_v16 }
 0x10c   : > { %v914_v19 = vpack.c.bf16 %v524_v18, %v523_v17 }
 0x10e   : > { %915 = vmatpush3.bf16.msra.mxu0 %v914_v19 }
 0x111   : > { %876 = vmatmul.mubr.msk.f32.vlgmr.msra.gmra.mrb[8].mxu0 %vm526_vm7, %v525_v20 }
 0x1e4   : > { %v596_v21 = vpop.f32.mrb[8].mxu0 }
 0x1e5   : > { %v877_v22 = vpop.f32.mrb[9].mxu0  ;;  %911 = vmatmul.mubr.f32.vlgmr.msra.gmra.mrb[4].mxu1 %v596_v21 }
 0x2b8   : > { %v682_v23 = vpop.f32.mrb[4].mxu1 }
 0x2b9   : > { %687 = vst.msk [vmem:[%s222_s24] sm:$0xff] %vm686_vm8, %v682_v23  ;;  %v912_v24 = vpop.f32.mrb[5].mxu1 }
 0x2ba PF: > { %s15_s18 = sadd.s32 1, %s976_s18  }
 0x2bb   : > { %p12_p4 = scmp.ge.s32.totalorder %s15_s18, 4  }
 0x2bd   :  { %14 = sbr.rel (!%p12_p4) target bundleno = 1 (0x1), region = 72 }

// kernel: tile.34
= control target key start
LH: loop header
LB: loop body
LE: loop exit
PB: predicated region body
PF: predicated region fallthrough
CT: control target
= control target key end

     0   :  { %s22_s0 = inlined_call_operand.vmem [shape: f32[8], index: 0, kind: input, shape index: {}]   ;;  %s23_s1 = inlined_call_operand.vmem [shape: f32[8,8], index: 1, kind: output, shape index: {}]  }
   0x1   :  { %v4_v0 = vld [vmem:[%s22_s0] ss:$0 sm:$0xff] }
   0x2   :  { %5 = vst [vmem:[%s23_s1] sm:$0xff] %v4_v0 }

// kernel: tile.35
= control target key start
LH: loop header
LB: loop body
LE: loop exit
PB: predicated region body
PF: predicated region fallthrough
CT: control target
= control target key end

     0   :  { %s67_s10 = smov 56   ;;  %s68_s11 = smov 40   ;;  %vm3_vm0 = vcmask 64512   ;;  %vm9_vm1 = vcmask 523712   ;;  %vm15_vm2 = vcmask 458112   ;;  %vm21_vm3 = vcmask 392512   ;;  %s111_s0 = inlined_call_operand.vmem [shape: f32[8,8], index: 0, kind: input, shape index: {}]   ;;  %s112_s1 = inlined_call_operand.vmem [shape: f32[1,64], index: 1, kind: output, shape index: {}]  }
   0x1   :  { %v53_v0 = vld [vmem:[%s111_s0 + $0x7] sm:$0x1]   ;;  %v55_v1 = vld [vmem:[%s111_s0 + $0x5] sm:$0x1]   ;;  %v54_v2 = vld [vmem:[%s111_s0 + $0x6] sm:$0x1]  }
   0x2   :  { %7 = vrot.lane.b32.xlu0 %v53_v0, %s67_s10  ;;  %19 = vrot.lane.b32.xlu1 %v55_v1, %s68_s11  ;;  %v56_v3 = vld [vmem:[%s111_s0 + $0x4] sm:$0x1]   ;;  %v2_v4 = vld [vmem:[%s111_s0] sm:$0x1]   ;;  %s69_s18 = smov 48   ;;  %s70_s19 = smov 32  }
   0x3   :  { %4 = vst.msk [vmem:[#allocation0] sm:$0x1] %vm3_vm0, %v2_v4   ;;  %v57_v5 = vld [vmem:[%s111_s0 + $0x3] sm:$0x1]   ;;  %v58_v6 = vld [vmem:[%s111_s0 + $0x2] sm:$0x1]  }
   0x4   :  { %s71_s24 = smov 24   ;;  %s72_s25 = smov 16   ;;  %v59_v7 = vld [vmem:[%s111_s0 + $0x1] sm:$0x1]   ;;  %vm27_vm4 = vcmask 326912   ;;  %vm33_vm5 = vcmask 261312  }
   0x5   :  { %s73_s0 = smov 8   ;;  %vm39_vm6 = vcmask 195712   ;;  %vm45_vm7 = vcmask 130112  }
   0x6   :  { %13 = vrot.lane.b32.xlu0 %v54_v2, %s69_s18  ;;  %25 = vrot.lane.b32.xlu1 %v56_v3, %s70_s19 }
   0xa   :  { %31 = vrot.lane.b32.xlu0 %v57_v5, %s71_s24  ;;  %37 = vrot.lane.b32.xlu1 %v58_v6, %s72_s25 }
   0xe   :  { %43 = vrot.lane.b32.xlu0 %v59_v7, %s73_s0 }
  0x74   :  { %v8_v8 = vpop.permute.xlu0 %7   ;;  %v20_v9 = vpop.permute.xlu1 %19  }
  0x75   :  { %10 = vst.msk [vmem:[#allocation0] sm:$0x1] %vm9_vm1, %v8_v8  }
  0x78   :  { %v14_v10 = vpop.permute.xlu0 %13   ;;  %v26_v11 = vpop.permute.xlu1 %25  }
  0x79   :  { %16 = vst.msk [vmem:[#allocation0] sm:$0x1] %vm15_vm2, %v14_v10  }
  0x7a   :  { %22 = vst.msk [vmem:[#allocation0] sm:$0x1] %vm21_vm3, %v20_v9  }
  0x7b   :  { %28 = vst.msk [vmem:[#allocation0] sm:$0x1] %vm27_vm4, %v26_v11  }
  0x7c   :  { %v32_v12 = vpop.permute.xlu0 %31   ;;  %v38_v13 = vpop.permute.xlu1 %37  }
  0x7d   :  { %34 = vst.msk [vmem:[#allocation0] sm:$0x1] %vm33_vm5, %v32_v12  }
  0x7e   :  { %40 = vst.msk [vmem:[#allocation0] sm:$0x1] %vm39_vm6, %v38_v13  }
  0x80   :  { %v44_v14 = vpop.permute.xlu0 %43  }
  0x81   :  { %46 = vst.msk [vmem:[#allocation0] sm:$0x1] %vm45_vm7, %v44_v14  }
  0x88   :  { %v50_v15 = vld [vmem:[#allocation0] sm:$0x1] }
  0x89   :  { %52 = vst [vmem:[%s112_s1] sm:$0x1] %v50_v15 }

// kernel: tile.46
= control target key start
LH: loop header
LB: loop body
LE: loop exit
PB: predicated region body
PF: predicated region fallthrough
CT: control target
= control target key end

     0   :  { %s22_s0 = inlined_call_operand.vmem [shape: f32[2], index: 0, kind: input, shape index: {}]   ;;  %s23_s1 = inlined_call_operand.vmem [shape: f32[8,2], index: 1, kind: output, shape index: {}]  }
   0x1   :  { %v4_v0 = vld [vmem:[%s22_s0] ss:$0 sm:$0xff] }
   0x2   :  { %5 = vst [vmem:[%s23_s1] sm:$0xff] %v4_v0 }

// kernel: tile.47
= control target key start
LH: loop header
LB: loop body
LE: loop exit
PB: predicated region body
PF: predicated region fallthrough
CT: control target
= control target key end

     0   :  { %s67_s10 = smov 14   ;;  %s68_s11 = smov 10   ;;  %vm3_vm0 = vcmask 15360   ;;  %vm9_vm1 = vcmask 130160   ;;  %vm15_vm2 = vcmask 113760   ;;  %vm21_vm3 = vcmask 97360   ;;  %s111_s0 = inlined_call_operand.vmem [shape: f32[8,2], index: 0, kind: input, shape index: {}]   ;;  %s112_s1 = inlined_call_operand.vmem [shape: f32[1,16], index: 1, kind: output, shape index: {}]  }
   0x1   :  { %v53_v0 = vld [vmem:[%s111_s0 + $0x7] sm:$0x1]   ;;  %v55_v1 = vld [vmem:[%s111_s0 + $0x5] sm:$0x1]   ;;  %v54_v2 = vld [vmem:[%s111_s0 + $0x6] sm:$0x1]  }
   0x2   :  { %7 = vrot.lane.b32.xlu0 %v53_v0, %s67_s10  ;;  %19 = vrot.lane.b32.xlu1 %v55_v1, %s68_s11  ;;  %v56_v3 = vld [vmem:[%s111_s0 + $0x4] sm:$0x1]   ;;  %v2_v4 = vld [vmem:[%s111_s0] sm:$0x1]   ;;  %s69_s18 = smov 12   ;;  %s70_s19 = smov 8  }
   0x3   :  { %4 = vst.msk [vmem:[#allocation0] sm:$0x1] %vm3_vm0, %v2_v4   ;;  %v57_v5 = vld [vmem:[%s111_s0 + $0x3] sm:$0x1]   ;;  %v58_v6 = vld [vmem:[%s111_s0 + $0x2] sm:$0x1]  }
   0x4   :  { %s71_s24 = smov 6   ;;  %s72_s25 = smov 4   ;;  %v59_v7 = vld [vmem:[%s111_s0 + $0x1] sm:$0x1]   ;;  %vm27_vm4 = vcmask 80960   ;;  %vm33_vm5 = vcmask 64560  }
   0x5   :  { %s73_s0 = smov 2   ;;  %vm39_vm6 = vcmask 48160   ;;  %vm45_vm7 = vcmask 31760  }
   0x6   :  { %13 = vrot.lane.b32.xlu0 %v54_v2, %s69_s18  ;;  %25 = vrot.lane.b32.xlu1 %v56_v3, %s70_s19 }
   0xa   :  { %31 = vrot.lane.b32.xlu0 %v57_v5, %s71_s24  ;;  %37 = vrot.lane.b32.xlu1 %v58_v6, %s72_s25 }
   0xe   :  { %43 = vrot.lane.b32.xlu0 %v59_v7, %s73_s0 }
  0x74   :  { %v8_v8 = vpop.permute.xlu0 %7   ;;  %v20_v9 = vpop.permute.xlu1 %19  }
  0x75   :  { %10 = vst.msk [vmem:[#allocation0] sm:$0x1] %vm9_vm1, %v8_v8  }
  0x78   :  { %v14_v10 = vpop.permute.xlu0 %13   ;;  %v26_v11 = vpop.permute.xlu1 %25  }
  0x79   :  { %16 = vst.msk [vmem:[#allocation0] sm:$0x1] %vm15_vm2, %v14_v10  }
  0x7a   :  { %22 = vst.msk [vmem:[#allocation0] sm:$0x1] %vm21_vm3, %v20_v9  }
  0x7b   :  { %28 = vst.msk [vmem:[#allocation0] sm:$0x1] %vm27_vm4, %v26_v11  }
  0x7c   :  { %v32_v12 = vpop.permute.xlu0 %31   ;;  %v38_v13 = vpop.permute.xlu1 %37  }
  0x7d   :  { %34 = vst.msk [vmem:[#allocation0] sm:$0x1] %vm33_vm5, %v32_v12  }
  0x7e   :  { %40 = vst.msk [vmem:[#allocation0] sm:$0x1] %vm39_vm6, %v38_v13  }
  0x80   :  { %v44_v14 = vpop.permute.xlu0 %43  }
  0x81   :  { %46 = vst.msk [vmem:[#allocation0] sm:$0x1] %vm45_vm7, %v44_v14  }
  0x88   :  { %v50_v15 = vld [vmem:[#allocation0] sm:$0x1] }
  0x89   :  { %52 = vst [vmem:[%s112_s1] sm:$0x1] %v50_v15 }

// kernel: _lambda_.7
= control target key start
LH: loop header
LB: loop body
LE: loop exit
PB: predicated region body
PF: predicated region fallthrough
CT: control target
= control target key end

     0   :  { %s677_s12 = smov 0   ;;  %s760_s0 = inlined_call_operand.vmem [shape: bf16[2,10,80], index: 0, kind: input, shape index: {}]   ;;  %s761_s1 = inlined_call_operand.vmem [shape: bf16[3,80,64], index: 1, kind: input, shape index: {}]   ;;  %s762_s2 = inlined_call_operand.vmem [shape: f32[1,64], index: 2, kind: input, shape index: {}]   ;;  %s763_s3 = inlined_call_operand.vmem [shape: f32[2,8,64], index: 3, kind: output, shape index: {}]  }
   0x1 LB: > { %s508_s13 = sadd.s32 4294967295, %s653_s12   ;;  %p512_p0 = scmp.ge.s32.totalorder %s653_s12, 1  ;;  %s653_s12 = sphi %s677_s12, %s13_s12  }
   0x2   : > { %p137_p1 = scmp.lt.s32.totalorder %s653_s12, 3 }
   0x4   : > { %p138_p2 = pnand %p512_p0, %p137_p1 }
   0x5   : > { %v630_v0 = vld [vmem:[%s761_s1 + $0x28] sm:$0xff] (!%p138_p2)   ;;  %v655_v1 = vmov (!%p138_p2), 0.0   ;;  %v631_v2 = vld [vmem:[%s761_s1] sm:$0xff] (!%p138_p2)   ;;  %v632_v3 = vld [vmem:[%s761_s1 + $0x30] sm:$0xff] (!%p138_p2)   ;;  %vm656_vm0 = vmmov (!%p138_p2), 0   ;;  %p160_p3 = scmp.lt.s32.totalorder (!%p138_p2), %s508_s13, 1 }
   0x6   : > { %141 = sbr.rel (%p138_p2) target bundleno = 266 (0x10a), region = 32  ;;  %578 = vmatprep.subr.bf16.mxu0 (!%p138_p2), %v655_v1  ;;  %592 = vmatprep.subr.bf16.mxu1 (!%p138_p2), %v655_v1  ;;  %v633_v4 = vld [vmem:[%s761_s1 + $0x8] sm:$0xff] (!%p138_p2)   ;;  %v634_v5 = vld [vmem:[%s761_s1 + $0x38] sm:$0xff] (!%p138_p2)   ;;  %v635_v6 = vld [vmem:[%s761_s1 + $0x10] sm:$0xff] (!%p138_p2)   ;;  %vm235_vm1 = vcmask (!%p138_p2), 654336   ;;  %vm453_vm3 = vcmask (!%p138_p2), 523264  }
   0x7   : > { %579 = vmatpush3.bf16.msra.mxu0 (!%p138_p2), %v630_v0  ;;  %588 = vmatprep.mubr.msk.bf16.mxu0 (!%p138_p2), %vm656_vm0, %v655_v1  ;;  %v636_v7 = vld [vmem:[%s761_s1 + $0x40] sm:$0xff] (!%p138_p2)   ;;  %v637_v10 = vld [vmem:[%s761_s1 + $0x18] sm:$0xff] (!%p138_p2)   ;;  %v638_v12 = vld [vmem:[%s761_s1 + $0x48] sm:$0xff] (!%p138_p2)  }
   0x8   : > { %593 = vmatpush3.bf16.msra.mxu1 (!%p138_p2), %v631_v2  ;;  %580 = vmatprep.subr.bf16.mxu0 (!%p138_p2), %v655_v1  ;;  %v639_v15 = vld [vmem:[%s761_s1 + $0x20] sm:$0xff] (!%p138_p2)   ;;  %v641_v18 = vld [vmem:[%s761_s1 + $0x50] sm:$0xff] (!%p138_p2)   ;;  %v642_v19 = vld [vmem:[%s761_s1 + $0x58] sm:$0xff] (!%p138_p2)  }
   0x9   : > { %594 = vmatprep.subr.bf16.mxu1 (!%p138_p2), %v655_v1  ;;  %602 = vmatprep.mubr.msk.bf16.mxu1 (!%p138_p2), %vm656_vm0, %v655_v1  ;;  %v643_v20 = vld [vmem:[%s761_s1 + $0x60] sm:$0xff] (!%p138_p2)   ;;  %v644_v21 = vld [vmem:[%s761_s1 + $0x68] sm:$0xff] (!%p138_p2)   ;;  %v645_v24 = vld [vmem:[%s761_s1 + $0x70] sm:$0xff] (!%p138_p2)  }
   0xa   : > { %v556_v36 = vld [vmem:[%s762_s2] ss:$0 sm:$0xff] (!%p138_p2) }
   0xb   : > { %581 = vmatpush3.bf16.msra.mxu0 (!%p138_p2), %v632_v3 }
   0xc   : > { %595 = vmatpush3.bf16.msra.mxu1 (!%p138_p2), %v633_v4  ;;  %582 = vmatprep.subr.bf16.mxu0 (!%p138_p2), %v655_v1 }
   0xd   : > { %s765_s13 = smov (!%p160_p3, %s508_s13), 1  ;;  %596 = vmatprep.subr.bf16.mxu1 %v655_v1 }
   0xe   : > { %s559_s24 = sshll.u32 %s765_s13, 3 }
   0xf   : > { %s713_s29 = scalar_lea.vmem %s760_s0, %s559_s24  ;;  %583 = vmatpush3.bf16.msra.mxu0 %v634_v5  ;;  %s168_s28 = scalar_lea.vmem %s763_s3, %s559_s24 }
  0x10   : > { %v170_v8 = vld [vmem:[%s713_s29] sm:$0xf]  ;;  %v181_v9 = vld [vmem:[%s713_s29 + $0x4] sm:$0x1]  ;;  %597 = vmatpush3.bf16.msra.mxu1 %v635_v6  ;;  %584 = vmatprep.subr.bf16.mxu0 %v655_v1 }
  0x11   : > { %v526_v11 = vcombine.low %v170_v8, %v181_v9  ;;  %598 = vmatprep.subr.bf16.mxu1 %v655_v1  ;;  %v352_v22 = vld [vmem:[%s713_s29] sm:$0xe] }
  0x12   : > { %v549_v23 = vcombine.low %v352_v22, %v181_v9 }
  0x13   : > { %v199_v13 = vshrl.u32 %v526_v11, 16  ;;  %v201_v14 = vshll.u32 %v526_v11, 16  ;;  %585 = vmatpush3.bf16.msra.mxu0 %v636_v7 }
  0x14   : > { %599 = vmatpush3.bf16.msra.mxu1 %v637_v10  ;;  %586 = vmatprep.subr.bf16.mxu0 %v655_v1  ;;  %v367_v25 = vrot.slane %v549_v23, 1 }
  0x15   : > { %v203_v16 = vrot.slane %v201_v14, 1  ;;  %600 = vmatprep.subr.bf16.mxu1 %v655_v1 }
  0x17   : > { %v204_v17 = vor.u32 %v203_v16, %v199_v13  ;;  %587 = vmatpush3.bf16.msra.mxu0 %v638_v12 }
  0x18   : > { %601 = vmatpush3.bf16.msra.mxu1 %v639_v15  ;;  %606 = vmatprep.subr.bf16.mxu0 %v655_v1 }
  0x1a   : > { %589 = vmatmul.mubr.msk.bf16.vlgmr.msra.gmra.mrb[0].mxu0 %vm235_vm1, %v204_v17 }
  0x1b   : > { %603 = vmatmul.mubr.msk.bf16.vlgmr.msra.gmra.mrb[0].mxu1 %vm235_vm1, %v170_v8  ;;  %607 = vmatpush3.bf16.msra.mxu0 %v641_v18 }
  0x1c   : > { %608 = vmatprep.subr.bf16.mxu0 %v655_v1  ;;  %616 = vmatprep.mubr.msk.bf16.mxu0 %vm656_vm0, %v655_v1 }
  0x1f   : > { %609 = vmatpush3.bf16.msra.mxu0 %v642_v19 }
  0x20   : > { %610 = vmatprep.subr.bf16.mxu0 %v655_v1 }
  0x23   : > { %611 = vmatpush3.bf16.msra.mxu0 %v643_v20 }
  0x24   : > { %612 = vmatprep.subr.bf16.mxu0 %v655_v1 }
  0x27   : > { %613 = vmatpush3.bf16.msra.mxu0 %v644_v21 }
  0x28   : > { %614 = vmatprep.subr.bf16.mxu0 %v655_v1 }
  0x2b   : > { %615 = vmatpush3.bf16.msra.mxu0 %v645_v24 }
  0x2e   : > { %617 = vmatmul.mubr.msk.bf16.vlgmr.msra.gmra.mrb[4].mxu0 %vm235_vm1, %v367_v25 }
  0xed   : > { %v273_v26 = vpop.f32.mrb[0].mxu0 }
  0xee   : > { %v590_v27 = vpop.f32.mrb[1].mxu0  ;;  %v346_v28 = vpop.f32.mrb[0].mxu1 }
  0xef   : > { %v347_v29 = vadd.f32 %v346_v28, %v273_v26  ;;  %v276_v30 = vpop.f32.mrb[2].mxu0  ;;  %v604_v31 = vpop.f32.mrb[1].mxu1 }
  0xf0   : > { %v591_v32 = vpop.f32.mrb[3].mxu0  ;;  %v349_v33 = vpop.f32.mrb[2].mxu1 }
  0xf1   : > { %v605_v34 = vpop.f32.mrb[3].mxu1 }
 0x101   : > { %v435_v35 = vpop.f32.mrb[4].mxu0 }
 0x102   : > { %v441_v37 = vadd.f32 %v435_v35, %v347_v29  ;;  %v618_v38 = vpop.f32.mrb[5].mxu0 }
 0x103   : > { %v438_v39 = vpop.f32.mrb[6].mxu0 }
 0x104   : > { %v449_v40 = vadd.f32 %v556_v36, %v441_v37  ;;  %v619_v41 = vpop.f32.mrb[7].mxu0 }
 0x106   : > { %vm450_vm2 = vcmp.gt.f32.partialorder %v449_v40, 0.0  ;;  %v451_v42 = vmul.f32 0.2, %v449_v40 }
 0x108   : > { %v452_v43 = vsel %vm450_vm2, %v449_v40, %v451_v42 }
 0x109   : > { %454 = vst.msk [vmem:[%s168_s28] sm:$0xff] %vm453_vm3, %v452_v43 }
 0x10a PF: > { %s13_s12 = sadd.s32 1, %s653_s12  }
 0x10b   : > { %p10_p4 = scmp.ge.s32.totalorder %s13_s12, 4  }
 0x10d   :  { %12 = sbr.rel (!%p10_p4) target bundleno = 1 (0x1), region = 64 }

// kernel: _lambda_.9
= control target key start
LH: loop header
LB: loop body
LE: loop exit
PB: predicated region body
PF: predicated region fallthrough
CT: control target
= control target key end

     0   :  { %s938_s21 = smov 0   ;;  %s1069_s0 = inlined_call_operand.vmem [shape: bf16[2,10,80], index: 0, kind: input, shape index: {}]   ;;  %s1070_s1 = inlined_call_operand.vmem [shape: bf16[3,80,64], index: 1, kind: input, shape index: {}]   ;;  %s1071_s2 = inlined_call_operand.vmem [shape: f32[1,64], index: 2, kind: input, shape index: {}]   ;;  %s1072_s3 = inlined_call_operand.vmem [shape: f32[2,8,64], index: 3, kind: input, shape index: {}]   ;;  %s1073_s4 = inlined_call_operand.vmem [shape: f32[64,16], index: 4, kind: input, shape index: {}]   ;;  %s1074_s5 = inlined_call_operand.vmem [shape: f32[1,16], index: 5, kind: input, shape index: {}]   ;;  %s1075_s6 = inlined_call_operand.vmem [shape: f32[2,8,16], index: 6, kind: output, shape index: {}]  }
   0x1 LB: > { %s709_s22 = sadd.s32 4294967295, %s898_s21   ;;  %p713_p0 = scmp.ge.s32.totalorder %s898_s21, 1  ;;  %s898_s21 = sphi %s938_s21, %s16_s21  }
   0x2   : > { %p221_p1 = scmp.lt.s32.totalorder %s898_s21, 3 }
   0x4   : > { %p222_p2 = pnand %p713_p0, %p221_p1 }
   0x5   : > { %v875_v0 = vld [vmem:[%s1070_s1 + $0x28] sm:$0xff] (!%p222_p2)   ;;  %v900_v1 = vmov (!%p222_p2), 0.0   ;;  %v876_v2 = vld [vmem:[%s1070_s1] sm:$0xff] (!%p222_p2)   ;;  %v877_v3 = vld [vmem:[%s1070_s1 + $0x30] sm:$0xff] (!%p222_p2)   ;;  %vm901_vm0 = vmmov (!%p222_p2), 0   ;;  %p254_p3 = scmp.lt.s32.totalorder (!%p222_p2), %s709_s22, 1 }
   0x6   : > { %225 = sbr.rel (%p222_p2) target bundleno = 482 (0x1e2), region = 44  ;;  %791 = vmatprep.subr.bf16.mxu0 (!%p222_p2), %v900_v1  ;;  %805 = vmatprep.subr.bf16.mxu1 (!%p222_p2), %v900_v1  ;;  %v878_v4 = vld [vmem:[%s1070_s1 + $0x8] sm:$0xff] (!%p222_p2)   ;;  %v879_v5 = vld [vmem:[%s1070_s1 + $0x38] sm:$0xff] (!%p222_p2)   ;;  %v880_v6 = vld [vmem:[%s1070_s1 + $0x10] sm:$0xff] (!%p222_p2)   ;;  %vm333_vm1 = vcmask (!%p222_p2), 654336   ;;  %v902_v28 = vmov (!%p222_p2), 0.0|0.0  }
   0x7   : > { %792 = vmatpush3.bf16.msra.mxu0 (!%p222_p2), %v875_v0  ;;  %801 = vmatprep.mubr.msk.bf16.mxu0 (!%p222_p2), %vm901_vm0, %v900_v1  ;;  %v881_v7 = vld [vmem:[%s1070_s1 + $0x40] sm:$0xff] (!%p222_p2)   ;;  %v882_v10 = vld [vmem:[%s1070_s1 + $0x18] sm:$0xff] (!%p222_p2)   ;;  %v883_v12 = vld [vmem:[%s1070_s1 + $0x48] sm:$0xff] (!%p222_p2)   ;;  %vm568_vm3 = vcmask (!%p222_p2), 523264   ;;  %vm642_vm4 = vcmask (!%p222_p2), 130048  }
   0x8   : > { %806 = vmatpush3.bf16.msra.mxu1 (!%p222_p2), %v876_v2  ;;  %793 = vmatprep.subr.bf16.mxu0 (!%p222_p2), %v900_v1  ;;  %v884_v15 = vld [vmem:[%s1070_s1 + $0x20] sm:$0xff] (!%p222_p2)   ;;  %v886_v18 = vld [vmem:[%s1070_s1 + $0x50] sm:$0xff] (!%p222_p2)   ;;  %v887_v19 = vld [vmem:[%s1070_s1 + $0x58] sm:$0xff] (!%p222_p2)  }
   0x9   : > { %807 = vmatprep.subr.bf16.mxu1 (!%p222_p2), %v900_v1  ;;  %815 = vmatprep.mubr.msk.bf16.mxu1 (!%p222_p2), %vm901_vm0, %v900_v1  ;;  %v888_v20 = vld [vmem:[%s1070_s1 + $0x60] sm:$0xff] (!%p222_p2)   ;;  %v889_v21 = vld [vmem:[%s1070_s1 + $0x68] sm:$0xff] (!%p222_p2)   ;;  %v890_v24 = vld [vmem:[%s1070_s1 + $0x70] sm:$0xff] (!%p222_p2)  }
   0xa   : > { %v553_v26 = vld [vmem:[%s1073_s4] sm:$0xff] (!%p222_p2)  ;;  %v554_v27 = vld [vmem:[%s1073_s4 + $0x8] sm:$0xff] (!%p222_p2)  ;;  %v555_v30 = vld [vmem:[%s1073_s4 + $0x10] sm:$0xff] (!%p222_p2) }
   0xb   : > { %794 = vmatpush3.bf16.msra.mxu0 (!%p222_p2), %v877_v3  ;;  %v853_v29 = vpack.c.bf16 (!%p222_p2), %v554_v27, %v553_v26  ;;  %v556_v31 = vld [vmem:[%s1073_s4 + $0x18] sm:$0xff] (!%p222_p2)  ;;  %v557_v33 = vld [vmem:[%s1073_s4 + $0x20] sm:$0xff] (!%p222_p2)  ;;  %v558_v34 = vld [vmem:[%s1073_s4 + $0x28] sm:$0xff] (!%p222_p2) }
   0xc   : > { %808 = vmatpush3.bf16.msra.mxu1 (!%p222_p2), %v878_v4  ;;  %795 = vmatprep.subr.bf16.mxu0 (!%p222_p2), %v900_v1  ;;  %v856_v32 = vpack.c.bf16 (!%p222_p2), %v556_v31, %v555_v30  ;;  %v859_v35 = vpack.c.bf16 (!%p222_p2), %v558_v34, %v557_v33  ;;  %v559_v36 = vld [vmem:[%s1073_s4 + $0x30] sm:$0xff] (!%p222_p2)  ;;  %v560_v37 = vld [vmem:[%s1073_s4 + $0x38] sm:$0xff] (!%p222_p2)  ;;  %v758_v49 = vld [vmem:[%s1071_s2] ss:$0 sm:$0xff] (!%p222_p2) }
   0xd   : > { %s1077_s22 = smov (!%p254_p3, %s709_s22), 1  ;;  %809 = vmatprep.subr.bf16.mxu1 %v900_v1  ;;  %v862_v38 = vpack.c.bf16 %v560_v37, %v559_v36  ;;  %v759_v59 = vld [vmem:[%s1074_s5] ss:$0 sm:$0xff] }
   0xe   : > { %s969_s9 = sshll.u32 %s1077_s22, 3 }
   0xf   : > { %s979_s14 = scalar_lea.vmem %s1069_s0, %s969_s9  ;;  %796 = vmatpush3.bf16.msra.mxu0 %v879_v5  ;;  %s262_s30 = scalar_lea.vmem %s1072_s3, %s969_s9 }
  0x10   : > { %v268_v8 = vld [vmem:[%s979_s14] sm:$0xf]  ;;  %v279_v9 = vld [vmem:[%s979_s14 + $0x4] sm:$0x1]  ;;  %810 = vmatpush3.bf16.msra.mxu1 %v880_v6  ;;  %797 = vmatprep.subr.bf16.mxu0 %v900_v1 }
  0x11   : > { %v728_v11 = vcombine.low %v268_v8, %v279_v9  ;;  %811 = vmatprep.subr.bf16.mxu1 %v900_v1  ;;  %v450_v22 = vld [vmem:[%s979_s14] sm:$0xe]  ;;  %s266_s14 = scalar_lea.vmem %s1075_s6, %s969_s9 }
  0x12   : > { %v751_v23 = vcombine.low %v450_v22, %v279_v9  ;;  %v548_v52 = vld [vmem:[%s262_s30] sm:$0xff] }
  0x13   : > { %v297_v13 = vshrl.u32 %v728_v11, 16  ;;  %v299_v14 = vshll.u32 %v728_v11, 16  ;;  %798 = vmatpush3.bf16.msra.mxu0 %v881_v7 }
  0x14   : > { %812 = vmatpush3.bf16.msra.mxu1 %v882_v10  ;;  %799 = vmatprep.subr.bf16.mxu0 %v900_v1  ;;  %v465_v25 = vrot.slane %v751_v23, 1 }
  0x15   : > { %v301_v16 = vrot.slane %v299_v14, 1  ;;  %813 = vmatprep.subr.bf16.mxu1 %v900_v1 }
  0x17   : > { %v302_v17 = vor.u32 %v301_v16, %v297_v13  ;;  %800 = vmatpush3.bf16.msra.mxu0 %v883_v12 }
  0x18   : > { %814 = vmatpush3.bf16.msra.mxu1 %v884_v15  ;;  %819 = vmatprep.subr.bf16.mxu0 %v900_v1 }
  0x19   : > { %852 = vmatprep.subr.bf16.mxu1 %v902_v28 }
  0x1a   : > { %802 = vmatmul.mubr.msk.bf16.vlgmr.msra.gmra.mrb[0].mxu0 %vm333_vm1, %v302_v17 }
  0x1b   : > { %816 = vmatmul.mubr.msk.bf16.vlgmr.msra.gmra.mrb[0].mxu1 %vm333_vm1, %v268_v8  ;;  %820 = vmatpush3.bf16.msra.mxu0 %v886_v18 }
  0x1c   : > { %821 = vmatprep.subr.bf16.mxu0 %v900_v1  ;;  %829 = vmatprep.mubr.msk.bf16.mxu0 %vm901_vm0, %v900_v1 }
  0x1d   : > { %849 = vmatprep.mubr.msk.f32.mxu1 %vm901_vm0, %v900_v1  ;;  %854 = vmatpush3.bf16.msra.mxu1 %v853_v29 }
  0x1e   : > { %855 = vmatprep.subr.bf16.mxu1 %v902_v28 }
  0x1f   : > { %822 = vmatpush3.bf16.msra.mxu0 %v887_v19 }
  0x20   : > { %823 = vmatprep.subr.bf16.mxu0 %v900_v1 }
  0x21   : > { %857 = vmatpush3.bf16.msra.mxu1 %v856_v32 }
  0x22   : > { %858 = vmatprep.subr.bf16.mxu1 %v902_v28 }
  0x23   : > { %824 = vmatpush3.bf16.msra.mxu0 %v888_v20 }
  0x24   : > { %825 = vmatprep.subr.bf16.mxu0 %v900_v1 }
  0x25   : > { %860 = vmatpush3.bf16.msra.mxu1 %v859_v35 }
  0x26   : > { %861 = vmatprep.subr.bf16.mxu1 %v902_v28 }
  0x27   : > { %826 = vmatpush3.bf16.msra.mxu0 %v889_v21 }
  0x28   : > { %827 = vmatprep.subr.bf16.mxu0 %v900_v1 }
  0x29   : > { %863 = vmatpush3.bf16.msra.mxu1 %v862_v38 }
  0x2b   : > { %828 = vmatpush3.bf16.msra.mxu0 %v890_v24 }
  0x2e   : > { %830 = vmatmul.mubr.msk.bf16.vlgmr.msra.gmra.mrb[4].mxu0 %vm333_vm1, %v465_v25 }
  0xed   : > { %v371_v39 = vpop.f32.mrb[0].mxu0 }
  0xee   : > { %v803_v40 = vpop.f32.mrb[1].mxu0  ;;  %v444_v41 = vpop.f32.mrb[0].mxu1 }
  0xef   : > { %v445_v42 = vadd.f32 %v444_v41, %v371_v39  ;;  %v374_v43 = vpop.f32.mrb[2].mxu0  ;;  %v817_v44 = vpop.f32.mrb[1].mxu1 }
  0xf0   : > { %v804_v45 = vpop.f32.mrb[3].mxu0  ;;  %v447_v46 = vpop.f32.mrb[2].mxu1 }
  0xf1   : > { %v818_v47 = vpop.f32.mrb[3].mxu1 }
 0x101   : > { %v533_v48 = vpop.f32.mrb[4].mxu0 }
 0x102   : > { %v539_v50 = vadd.f32 %v533_v48, %v445_v42  ;;  %v831_v51 = vpop.f32.mrb[5].mxu0 }
 0x103   : > { %v536_v53 = vpop.f32.mrb[6].mxu0 }
 0x104   : > { %v547_v54 = vadd.f32 %v758_v49, %v539_v50  ;;  %v832_v55 = vpop.f32.mrb[7].mxu0 }
 0x106   : > { %v549_v56 = vadd.f32 %v548_v52, %v547_v54 }
 0x108   : > { %v551_v57 = vmul.f32 0.2, %v549_v56  ;;  %vm550_vm2 = vcmp.gt.f32.partialorder %v549_v56, 0.0 }
 0x10a   : > { %v552_v58 = vsel %vm550_vm2, %v549_v56, %v551_v57 }
 0x10b   : > { %850 = vmatmul.mubr.msk.f32.vlgmr.msra.gmra.mrb[4].mxu1 %vm568_vm3, %v552_v58 }
 0x1de   : > { %v638_v60 = vpop.f32.mrb[4].mxu1 }
 0x1df   : > { %v639_v61 = vadd.f32 %v759_v59, %v638_v60  ;;  %v851_v62 = vpop.f32.mrb[5].mxu1 }
 0x1e1   : > { %643 = vst.msk [vmem:[%s266_s14] sm:$0xff] %vm642_vm4, %v639_v61 }
 0x1e2 PF: > { %s16_s21 = sadd.s32 1, %s898_s21  }
 0x1e3   : > { %p13_p4 = scmp.ge.s32.totalorder %s16_s21, 4  }
 0x1e5   :  { %15 = sbr.rel (!%p13_p4) target bundleno = 1 (0x1), region = 79 }

</bundles_post_ra>
